<compile_context>
chip_gen: v7x
topology: tpu7x:2x2x1
jax: 0.10.0
libtpu: 0.0.40
codegen_flags: <defaults>
</compile_context>

<pallas_src>
import jax
import jax.numpy as jnp
import numpy as np
from jax.experimental import pallas as pl
from jax.experimental.pallas import tpu as pltpu


def _round_up(x, m):
    return ((x + m - 1) // m) * m


def _build_kernel(last_n, tS, Chp):
    def kernel(*args):
        x_refs = args[:last_n]                        # last_n x [tS, H] bf16 tiles
        (mask_ref, msum_ref, w1_ref, b1_ref,
         w20_ref, w21_ref, b2_ref, out_ref, pooled_ref, acar_ref) = args[last_n:]

        s = pl.program_id(1)

        @pl.when(s == 0)
        def _init():
            pooled_ref[...] = jnp.zeros_like(pooled_ref)
            acar_ref[...] = jnp.zeros_like(acar_ref)

        # conv1: both taps as ONE bf16 MXU matmul per hidden-state chunk (the
        # un-materialized channel concat), accumulated in f32 over the chunks.
        ab = None                                                    # [tS, 2*Chp]
        for i in range(last_n):
            xi = x_refs[i][...]                                      # [tS, H] bf16
            abi = jnp.dot(xi, w1_ref[i], preferred_element_type=jnp.float32)
            ab = abi if ab is None else ab + abi
        a = ab[:, :Chp]          # x[p] @ W1[:, :, 0].T
        b = ab[:, Chp:]          # x[p] @ W1[:, :, 1].T

        # h[p] = relu(a[p-1] + b[p] + b1)  (Conv1d padding=1 semantics); a[p-1] for the
        # first row of this tile is the carried last row of the previous tile's a.
        row = jax.lax.broadcasted_iota(jnp.int32, (tS, 1), 0)
        a_shift = jnp.where(row == 0, acar_ref[...],
                            pltpu.roll(a, shift=1, axis=0))
        h = jnp.maximum(a_shift + b + b1_ref[...], 0.0)              # [tS, Chp] f32
        acar_ref[...] = a[tS - 1:tS, :]                              # carry forward

        # Masked reductions on the MXU: mask row 0 -> pooled_u, row 1 -> pooled_v.
        pooled_ref[...] += jnp.dot(mask_ref[...], h,
                                   preferred_element_type=jnp.float32)  # [2, Chp]

        # Epilogue: conv2 taps applied once to the pooled vectors, then mean-divide.
        @pl.when(s == pl.num_programs(1) - 1)
        def _finalize():
            msum = msum_ref[...]                                     # [1, 1]
            num = (jnp.dot(pooled_ref[0:1, :], w20_ref[...],
                           preferred_element_type=jnp.float32)
                   + jnp.dot(pooled_ref[1:2, :], w21_ref[...],
                             preferred_element_type=jnp.float32)
                   + msum * b2_ref[...])                             # [1, C4p]
            out_ref[...] = num / jnp.maximum(msum, 1e-9)

    return kernel


def conv1d_pooling(all_hidden_states, attention_mask, params, *, seq_tile=None):
    """JAX/Pallas equivalent of Conv1DPooling.forward -> [B, C//4]."""
    last_n = int(params["last_n"])
    W1, b1, W2, b2 = params["W1"], params["b1"], params["W2"], params["b2"]

    Ch, C, _ = W1.shape                       # Conv1d(C -> C//2, k=2)
    C4 = W2.shape[0]                          # Conv1d(C//2 -> C//4, k=2)
    H = C // last_n

    hs = [all_hidden_states[-(i + 1)] for i in range(last_n)]   # concat order
    B, S, Hh = hs[0].shape
    assert Hh == H, "hidden size must equal conv_in_dim // last_n"

    LANE, SUB = 128, 16
    Chp = _round_up(Ch, LANE)                 # lane-dense h / matmul-N
    C4p = _round_up(C4, LANE)                 # lane-dense output

    # Sequence tile.  Padded length Sp >= S+1 so the extra conv1 output position
    # (right zero-pad of the conv) is produced by an ordinary zero-padded x row.
    if seq_tile is None:
        seq_tile = 256 if S + 1 > 256 else _round_up(S + 1, SUB)
    tS = int(seq_tile)
    assert tS % SUB == 0, "seq_tile must be a multiple of 16"
    Sp = _round_up(S + 1, tS)
    n_tiles = Sp // tS

    # Activations: bf16 (MXU-native), sequence zero-padded.  The channel concat is
    # never written to HBM -- each of the last_n layers is its own kernel operand.
    xs = [jnp.pad(h.astype(jnp.bfloat16), ((0, 0), (0, Sp - S), (0, 0))) for h in hs]

    # Mask rows: row 0 weights h[p] by m[p] (pooled_u), row 1 by m[p-1] (pooled_v);
    # laid out per sequence tile so any tS keeps fully legal, lane-dense blocks.
    m = attention_mask.astype(jnp.float32)                            # [B, S]
    m_p = jnp.pad(m, ((0, 0), (0, Sp - S)))
    m_s = jnp.pad(m, ((0, 0), (1, Sp - S - 1)))                       # m_s[p] = m[p-1]
    mask2 = jnp.stack([m_p, m_s], axis=1)                             # [B, 2, Sp]
    mask2 = mask2.reshape(B, 2, n_tiles, tS).transpose(0, 2, 1, 3)    # [B, nt, 2, tS]
    msum = jnp.sum(m, axis=1).reshape(B, 1, 1)

    # Conv weights -> per-tap matmul form, zero-padded to lane multiples of 128.
    # Stage-1 taps concatenated along N ([H, tap0 | tap1]) in bf16; stage-2 stays f32.
    w10 = jnp.pad(W1[:, :, 0].T, ((0, 0), (0, Chp - Ch))).reshape(last_n, H, Chp)
    w11 = jnp.pad(W1[:, :, 1].T, ((0, 0), (0, Chp - Ch))).reshape(last_n, H, Chp)
    w1cat = jnp.concatenate([w10, w11], axis=-1).astype(jnp.bfloat16)  # [last_n,H,2Chp]
    b1p = jnp.pad(b1, (0, Chp - Ch)).reshape(1, Chp).astype(jnp.float32)
    w20 = jnp.pad(W2[:, :, 0].T, ((0, Chp - Ch), (0, C4p - C4))).astype(jnp.float32)
    w21 = jnp.pad(W2[:, :, 1].T, ((0, Chp - Ch), (0, C4p - C4))).astype(jnp.float32)
    b2p = jnp.pad(b2, (0, C4p - C4)).reshape(1, C4p).astype(jnp.float32)

    kernel = _build_kernel(last_n, tS, Chp)

    cost = pl.CostEstimate(
        flops=int(2 * B * Sp * C * 2 * Chp          # conv1 taps (dominant)
                  + 2 * B * Sp * 2 * Chp            # masked MXU reductions
                  + 2 * B * 2 * Chp * C4p),         # conv2 on pooled vectors
        transcendentals=0,
        bytes_accessed=int(last_n * B * Sp * H * 2 + B * n_tiles * 2 * tS * 4
                           + last_n * H * 2 * Chp * 2 + 2 * Chp * C4p * 4
                           + (Chp + C4p) * 4 + B * 4 + B * C4p * 4),
    )

    def call(single_buffer_weights):
        def wspec(shape):
            idx = lambda b, s, _n=len(shape): (0,) * _n   # constant block index
            if single_buffer_weights:
                return pl.BlockSpec(shape, idx, pipeline_mode=pl.Buffered(1))
            return pl.BlockSpec(shape, idx)

        in_specs = (
            [pl.BlockSpec((None, tS, H), lambda b, s: (b, s, 0))] * last_n
            + [pl.BlockSpec((None, None, 2, tS), lambda b, s: (b, s, 0, 0)),  # masks
               pl.BlockSpec((None, 1, 1), lambda b, s: (b, 0, 0)),            # msum
               wspec((last_n, H, 2 * Chp)), wspec((1, Chp)),
               wspec((Chp, C4p)), wspec((Chp, C4p)), wspec((1, C4p))]
        )
        return pl.pallas_call(
            kernel,
            out_shape=jax.ShapeDtypeStruct((B, 1, C4p), jnp.float32),
            grid=(B, n_tiles),
            in_specs=in_specs,
            out_specs=pl.BlockSpec((None, 1, C4p), lambda b, s: (b, 0, 0)),
            scratch_shapes=[pltpu.VMEM((2, Chp), jnp.float32),   # pooled_u / pooled_v
                            pltpu.VMEM((1, Chp), jnp.float32)],  # carried a[p-1] row
            compiler_params=pltpu.CompilerParams(
                dimension_semantics=("parallel", "arbitrary"),
                vmem_limit_bytes=48 * 1024 * 1024),
            cost_estimate=cost,
        )(*xs, mask2, msum, w1cat, b1p, w20, w21, b2p)

    try:
        out = call(True)      # single-buffer the constant-index weight operands
    except Exception:         # pipeline_mode=pl.Buffered(1) unsupported in this build
        out = call(False)
    return out[:, 0, :C4]


def ref_forward(all_hidden_states, attention_mask, params):
    """Pure-JAX f32 reference mirroring the PyTorch forward (NCL convs + padding)."""
    last_n = params["last_n"]
    W1, b1, W2, b2 = params["W1"], params["b1"], params["W2"], params["b2"]
    concat = jnp.concatenate(
        [all_hidden_states[-(i + 1)] for i in range(last_n)], axis=-1
    )                                              # [B, S, C]
    x = jnp.transpose(concat, (0, 2, 1))           # [B, C, S]
    xp = jnp.pad(x, ((0, 0), (0, 0), (1, 1)))      # padding=1
    out1 = (jnp.einsum("oc,bct->bot", W1[:, :, 0], xp[:, :, :-1])
            + jnp.einsum("oc,bct->bot", W1[:, :, 1], xp[:, :, 1:])
            + b1[None, :, None])                   # [B, C//2, S+1]
    h = jnp.maximum(out1, 0.0)
    out2 = (jnp.einsum("oc,bct->bot", W2[:, :, 0], h[:, :, :-1])
            + jnp.einsum("oc,bct->bot", W2[:, :, 1], h[:, :, 1:])
            + b2[None, :, None])                   # [B, C//4, S]
    emb = jnp.transpose(out2, (0, 2, 1))           # [B, S, C//4]
    m = attention_mask.astype(jnp.float32)[:, :, None]
    return (emb * m).sum(1) / jnp.clip(m.sum(1), 1e-9)


if __name__ == "__main__":
    B, S, H = 2, 16, 32
    last_n = 2
    num_layers = 4                                  # length of "all_hidden_states"
    C = H * last_n
    Ch, C4 = C // 2, C // 4

    key = jax.random.PRNGKey(0)
    keys = jax.random.split(key, num_layers + 4)
    all_hidden_states = [
        jax.random.normal(keys[i], (B, S, H), jnp.float32) for i in range(num_layers)
    ]

    # Conv1d parameter shapes match nn.Conv1d(C, C//2, 2) / nn.Conv1d(C//2, C//4, 2)
    W1 = (jax.random.uniform(keys[num_layers + 0], (Ch, C, 2), jnp.float32) - 0.5) * 0.2
    b1 = (jax.random.uniform(keys[num_layers + 1], (Ch,), jnp.float32) - 0.5) * 0.2
    W2 = (jax.random.uniform(keys[num_layers + 2], (C4, Ch, 2), jnp.float32) - 0.5) * 0.2
    b2 = (jax.random.uniform(keys[num_layers + 3], (C4,), jnp.float32) - 0.5) * 0.2
    params = dict(last_n=last_n, W1=W1, b1=b1, W2=W2, b2=b2)

    attention_mask = jnp.array(
        [[1] * 16,
         [1] * 10 + [0] * 6], dtype=jnp.int32)

    # seq_tile=16 -> 2 sequence tiles, exercising the cross-tile carry + accumulators.
    out = conv1d_pooling(all_hidden_states, attention_mask, params, seq_tile=16)
    out = jax.block_until_ready(out)

    ref = ref_forward(all_hidden_states, attention_mask, params)
    # bf16 matmul inputs (f32 accumulation) -> loosened tolerance vs. pure-f32 reference.
    np.testing.assert_allclose(np.asarray(out), np.asarray(ref), rtol=2e-2, atol=2e-2)
    print("KERNEL_OK")
</pallas_src>

<mosaic_0001>
module attributes {stable_mosaic.version = 11 : i64} {
  func.func @kernel(%arg0: i32, %arg1: i32, %arg2: memref<1x16x32xbf16, #tpu.memory_space<vmem>>, %arg3: memref<1x16x32xbf16, #tpu.memory_space<vmem>>, %arg4: memref<1x1x2x16xf32, #tpu.memory_space<vmem>>, %arg5: memref<1x1x1xf32, #tpu.memory_space<vmem>>, %arg6: memref<2x32x256xbf16, #tpu.memory_space<vmem>>, %arg7: memref<1x128xf32, #tpu.memory_space<vmem>>, %arg8: memref<128x128xf32, #tpu.memory_space<vmem>>, %arg9: memref<128x128xf32, #tpu.memory_space<vmem>>, %arg10: memref<1x128xf32, #tpu.memory_space<vmem>>, %arg11: memref<1x1x128xf32, #tpu.memory_space<vmem>>, %arg12: memref<2x128xf32, #tpu.memory_space<vmem>>, %arg13: memref<1x128xf32, #tpu.memory_space<vmem>>) attributes {dimension_semantics = [#tpu.dimension_semantics<parallel>, #tpu.dimension_semantics<arbitrary>], iteration_bounds = array<i64: 2, 2>, scalar_prefetch = 0 : i64, scratch_operands = 2 : i64, tpu.core_type = #tpu.core_type<tc>, window_params = [{transform_indices = @transform_0, window_bounds = array<i64: 1, 16, 32>}, {transform_indices = @transform_1, window_bounds = array<i64: 1, 16, 32>}, {transform_indices = @transform_2, window_bounds = array<i64: 1, 1, 2, 16>}, {transform_indices = @transform_3, window_bounds = array<i64: 1, 1, 1>}, {pipeline_mode = #tpu.pipeline_mode<synchronous>, transform_indices = @transform_4, window_bounds = array<i64: 2, 32, 256>}, {pipeline_mode = #tpu.pipeline_mode<synchronous>, transform_indices = @transform_5, window_bounds = array<i64: 1, 128>}, {pipeline_mode = #tpu.pipeline_mode<synchronous>, transform_indices = @transform_6, window_bounds = array<i64: 128, 128>}, {pipeline_mode = #tpu.pipeline_mode<synchronous>, transform_indices = @transform_7, window_bounds = array<i64: 128, 128>}, {pipeline_mode = #tpu.pipeline_mode<synchronous>, transform_indices = @transform_8, window_bounds = array<i64: 1, 128>}, {transform_indices = @transform_9, window_bounds = array<i64: 1, 1, 128>}]} {
    %c0_i32 = arith.constant 0 : i32
    %0 = arith.cmpi eq, %arg1, %c0_i32 : i32
    %1 = arith.extui %0 : i1 to i32
    %c0_i32_0 = arith.constant 0 : i32
    %2 = arith.cmpi ne, %1, %c0_i32_0 : i32
    scf.if %2 {
      %cst_31 = arith.constant 0.000000e+00 : f32
      %43 = vector.broadcast %cst_31 : f32 to vector<2x128xf32>
      %c0_32 = arith.constant 0 : index
      %c0_33 = arith.constant 0 : index
      %44 = vector.load %arg12[%c0_32, %c0_33] : memref<2x128xf32, #tpu.memory_space<vmem>>, vector<2x128xf32>
      tpu.vector_store %arg12[%c0_32, %c0_33], %43 {strides = array<i32>} : memref<2x128xf32, #tpu.memory_space<vmem>>, vector<2x128xf32>,
      %cst_34 = arith.constant 0.000000e+00 : f32
      %45 = vector.broadcast %cst_34 : f32 to vector<1x128xf32>
      %c0_35 = arith.constant 0 : index
      %c0_36 = arith.constant 0 : index
      %46 = vector.load %arg13[%c0_35, %c0_36] : memref<1x128xf32, #tpu.memory_space<vmem>>, vector<1x128xf32>
      tpu.vector_store %arg13[%c0_35, %c0_36], %45 {strides = array<i32>} : memref<1x128xf32, #tpu.memory_space<vmem>>, vector<1x128xf32>,
    } else {
    }
    %c0 = arith.constant 0 : index
    %c0_1 = arith.constant 0 : index
    %c0_2 = arith.constant 0 : index
    %3 = vector.load %arg2[%c0, %c0_1, %c0_2] : memref<1x16x32xbf16, #tpu.memory_space<vmem>>, vector<1x16x32xbf16>
    %4 = vector.shape_cast %3 : vector<1x16x32xbf16> to vector<16x32xbf16>
    %c0_3 = arith.constant 0 : index
    %c0_4 = arith.constant 0 : index
    %c0_5 = arith.constant 0 : index
    %5 = vector.load %arg6[%c0_3, %c0_4, %c0_5] : memref<2x32x256xbf16, #tpu.memory_space<vmem>>, vector<1x32x256xbf16>
    %6 = vector.shape_cast %5 : vector<1x32x256xbf16> to vector<32x256xbf16>
    %cst = arith.constant dense<0.000000e+00> : vector<16x256xf32>
    %7 = tpu.matmul %4, %6, %cst {dimension_numbers = #tpu.dot_dimension_numbers<[1], [0], [0], [1], [0, 0, 1, 1], [], []>} : vector<16x32xbf16>, vector<32x256xbf16>, vector<16x256xf32> -> vector<16x256xf32>
    %c0_6 = arith.constant 0 : index
    %c0_7 = arith.constant 0 : index
    %c0_8 = arith.constant 0 : index
    %8 = vector.load %arg3[%c0_6, %c0_7, %c0_8] : memref<1x16x32xbf16, #tpu.memory_space<vmem>>, vector<1x16x32xbf16>
    %9 = vector.shape_cast %8 : vector<1x16x32xbf16> to vector<16x32xbf16>
    %c1 = arith.constant 1 : index
    %c0_9 = arith.constant 0 : index
    %c0_10 = arith.constant 0 : index
    %10 = vector.load %arg6[%c1, %c0_9, %c0_10] : memref<2x32x256xbf16, #tpu.memory_space<vmem>>, vector<1x32x256xbf16>
    %11 = vector.shape_cast %10 : vector<1x32x256xbf16> to vector<32x256xbf16>
    %cst_11 = arith.constant dense<0.000000e+00> : vector<16x256xf32>
    %12 = tpu.matmul %9, %11, %cst_11 {dimension_numbers = #tpu.dot_dimension_numbers<[1], [0], [0], [1], [0, 0, 1, 1], [], []>} : vector<16x32xbf16>, vector<32x256xbf16>, vector<16x256xf32> -> vector<16x256xf32>
    %13 = arith.addf %7, %12 : vector<16x256xf32>
    %14 = vector.extract_strided_slice %13 {offsets = [0, 0], sizes = [16, 128], strides = [1, 1]} : vector<16x256xf32> to vector<16x128xf32>
    %15 = vector.extract_strided_slice %13 {offsets = [0, 128], sizes = [16, 128], strides = [1, 1]} : vector<16x256xf32> to vector<16x128xf32>
    %16 = tpu.iota {dimensions = array<i32: 0>} : vector<16x1xi32>
    %c0_i32_12 = arith.constant 0 : i32
    %17 = vector.broadcast %c0_i32_12 : i32 to vector<16x1xi32>
    %18 = arith.cmpi eq, %16, %17 : vector<16x1xi32>
    %c0_13 = arith.constant 0 : index
    %c0_14 = arith.constant 0 : index
    %19 = vector.load %arg13[%c0_13, %c0_14] : memref<1x128xf32, #tpu.memory_space<vmem>>, vector<1x128xf32>
    %c1_i32 = arith.constant 1 : i32
    %20 = tpu.dynamic_rotate %14 by %c1_i32 dim 0 : vector<16x128xf32>, i32 -> vector<16x128xf32>
    %21 = vector.shape_cast %18 : vector<16x1xi1> to vector<16x1xi1>
    %22 = vector.broadcast %21 : vector<16x1xi1> to vector<16x128xi1>
    %23 = vector.shape_cast %19 : vector<1x128xf32> to vector<1x128xf32>
    %24 = vector.broadcast %23 : vector<1x128xf32> to vector<16x128xf32>
    %25 = arith.select %22, %24, %20 : vector<16x128xi1>, vector<16x128xf32>
    %26 = arith.addf %25, %15 : vector<16x128xf32>
    %c0_15 = arith.constant 0 : index
    %c0_16 = arith.constant 0 : index
    %27 = vector.load %arg7[%c0_15, %c0_16] : memref<1x128xf32, #tpu.memory_space<vmem>>, vector<1x128xf32>
    %28 = vector.broadcast %27 : vector<1x128xf32> to vector<16x128xf32>
    %29 = arith.addf %26, %28 : vector<16x128xf32>
    %cst_17 = arith.constant 0.000000e+00 : f32
    %30 = vector.broadcast %cst_17 : f32 to vector<16x128xf32>
    %31 = arith.maximumf %29, %30 : vector<16x128xf32>
    %32 = vector.extract_strided_slice %14 {offsets = [15, 0], sizes = [1, 128], strides = [1, 1]} : vector<16x128xf32> to vector<1x128xf32>
    %c0_18 = arith.constant 0 : index
    %c0_19 = arith.constant 0 : index
    %33 = vector.load %arg13[%c0_18, %c0_19] : memref<1x128xf32, #tpu.memory_space<vmem>>, vector<1x128xf32>
    tpu.vector_store %arg13[%c0_18, %c0_19], %32 {strides = array<i32>} : memref<1x128xf32, #tpu.memory_space<vmem>>, vector<1x128xf32>,
    %c0_20 = arith.constant 0 : index
    %c0_21 = arith.constant 0 : index
    %34 = vector.load %arg12[%c0_20, %c0_21] : memref<2x128xf32, #tpu.memory_space<vmem>>, vector<2x128xf32>
    %c0_22 = arith.constant 0 : index
    %c0_23 = arith.constant 0 : index
    %c0_24 = arith.constant 0 : index
    %c0_25 = arith.constant 0 : index
    %35 = vector.load %arg4[%c0_22, %c0_23, %c0_24, %c0_25] : memref<1x1x2x16xf32, #tpu.memory_space<vmem>>, vector<1x1x2x16xf32>
    %36 = vector.shape_cast %35 : vector<1x1x2x16xf32> to vector<2x16xf32>
    %cst_26 = arith.constant dense<0.000000e+00> : vector<2x128xf32>
    %37 = tpu.matmul %36, %31, %cst_26 {dimension_numbers = #tpu.dot_dimension_numbers<[1], [0], [0], [1], [0, 0, 1, 1], [], []>} : vector<2x16xf32>, vector<16x128xf32>, vector<2x128xf32> -> vector<2x128xf32>
    %38 = arith.addf %34, %37 : vector<2x128xf32>
    %c0_27 = arith.constant 0 : index
    %c0_28 = arith.constant 0 : index
    %39 = vector.load %arg12[%c0_27, %c0_28] : memref<2x128xf32, #tpu.memory_space<vmem>>, vector<2x128xf32>
    tpu.vector_store %arg12[%c0_27, %c0_28], %38 {strides = array<i32>} : memref<2x128xf32, #tpu.memory_space<vmem>>, vector<2x128xf32>,
    %c1_i32_29 = arith.constant 1 : i32
    %40 = arith.cmpi eq, %arg1, %c1_i32_29 : i32
    %41 = arith.extui %40 : i1 to i32
    %c0_i32_30 = arith.constant 0 : i32
    %42 = arith.cmpi ne, %41, %c0_i32_30 : i32
    scf.if %42 {
      %c0_31 = arith.constant 0 : index
      %c0_32 = arith.constant 0 : index
      %c0_33 = arith.constant 0 : index
      %43 = vector.load %arg5[%c0_31, %c0_32, %c0_33] : memref<1x1x1xf32, #tpu.memory_space<vmem>>, vector<1x1x1xf32>
      %44 = vector.shape_cast %43 : vector<1x1x1xf32> to vector<1x1xf32>
      %c0_34 = arith.constant 0 : index
      %c0_35 = arith.constant 0 : index
      %45 = vector.load %arg12[%c0_34, %c0_35] : memref<2x128xf32, #tpu.memory_space<vmem>>, vector<1x128xf32>
      %c0_36 = arith.constant 0 : index
      %c0_37 = arith.constant 0 : index
      %46 = vector.load %arg8[%c0_36, %c0_37] : memref<128x128xf32, #tpu.memory_space<vmem>>, vector<128x128xf32>
      %cst_38 = arith.constant dense<0.000000e+00> : vector<1x128xf32>
      %47 = tpu.matmul %45, %46, %cst_38 {dimension_numbers = #tpu.dot_dimension_numbers<[1], [0], [0], [1], [0, 0, 1, 1], [], []>} : vector<1x128xf32>, vector<128x128xf32>, vector<1x128xf32> -> vector<1x128xf32>
      %c1_39 = arith.constant 1 : index
      %c0_40 = arith.constant 0 : index
      %48 = vector.load %arg12[%c1_39, %c0_40] : memref<2x128xf32, #tpu.memory_space<vmem>>, vector<1x128xf32>
      %c0_41 = arith.constant 0 : index
      %c0_42 = arith.constant 0 : index
      %49 = vector.load %arg9[%c0_41, %c0_42] : memref<128x128xf32, #tpu.memory_space<vmem>>, vector<128x128xf32>
      %cst_43 = arith.constant dense<0.000000e+00> : vector<1x128xf32>
      %50 = tpu.matmul %48, %49, %cst_43 {dimension_numbers = #tpu.dot_dimension_numbers<[1], [0], [0], [1], [0, 0, 1, 1], [], []>} : vector<1x128xf32>, vector<128x128xf32>, vector<1x128xf32> -> vector<1x128xf32>
      %51 = arith.addf %47, %50 : vector<1x128xf32>
      %c0_44 = arith.constant 0 : index
      %c0_45 = arith.constant 0 : index
      %52 = vector.load %arg10[%c0_44, %c0_45] : memref<1x128xf32, #tpu.memory_space<vmem>>, vector<1x128xf32>
      %53 = vector.broadcast %44 : vector<1x1xf32> to vector<1x128xf32>
      %54 = arith.mulf %53, %52 : vector<1x128xf32>
      %55 = arith.addf %51, %54 : vector<1x128xf32>
      %cst_46 = arith.constant 9.99999971E-10 : f32
      %56 = vector.broadcast %cst_46 : f32 to vector<1x1xf32>
      %57 = arith.maximumf %44, %56 : vector<1x1xf32>
      %58 = vector.broadcast %57 : vector<1x1xf32> to vector<1x128xf32>
      %59 = arith.divf %55, %58 : vector<1x128xf32>
      %c0_47 = arith.constant 0 : index
      %c0_48 = arith.constant 0 : index
      %c0_49 = arith.constant 0 : index
      %60 = vector.load %arg11[%c0_47, %c0_48, %c0_49] : memref<1x1x128xf32, #tpu.memory_space<vmem>>, vector<1x1x128xf32>
      %61 = vector.shape_cast %60 : vector<1x1x128xf32> to vector<1x128xf32>
      %62 = vector.shape_cast %59 : vector<1x128xf32> to vector<1x1x128xf32>
      tpu.vector_store %arg11[%c0_47, %c0_48, %c0_49], %62 {strides = array<i32>} : memref<1x1x128xf32, #tpu.memory_space<vmem>>, vector<1x1x128xf32>,
    } else {
    }
    return
  }
  func.func @transform_0(%arg0: i32, %arg1: i32) -> (i32, i32, i32) {
    %c0_i32 = arith.constant 0 : i32
    %c0_i32_0 = arith.constant 0 : i32
    return %arg0, %arg1, %c0_i32 : i32, i32, i32
  }
  func.func @transform_1(%arg0: i32, %arg1: i32) -> (i32, i32, i32) {
    %c0_i32 = arith.constant 0 : i32
    %c0_i32_0 = arith.constant 0 : i32
    return %arg0, %arg1, %c0_i32 : i32, i32, i32
  }
  func.func @transform_2(%arg0: i32, %arg1: i32) -> (i32, i32, i32, i32) {
    %c0_i32 = arith.constant 0 : i32
    %c0_i32_0 = arith.constant 0 : i32
    %c0_i32_1 = arith.constant 0 : i32
    return %arg0, %arg1, %c0_i32, %c0_i32_0 : i32, i32, i32, i32
  }
  func.func @transform_3(%arg0: i32, %arg1: i32) -> (i32, i32, i32) {
    %c0_i32 = arith.constant 0 : i32
    %c0_i32_0 = arith.constant 0 : i32
    %c0_i32_1 = arith.constant 0 : i32
    return %arg0, %c0_i32, %c0_i32_0 : i32, i32, i32
  }
  func.func @transform_4(%arg0: i32, %arg1: i32) -> (i32, i32, i32) {
    %c0_i32 = arith.constant 0 : i32
    %c0_i32_0 = arith.constant 0 : i32
    %c0_i32_1 = arith.constant 0 : i32
    %c0_i32_2 = arith.constant 0 : i32
    return %c0_i32, %c0_i32_0, %c0_i32_1 : i32, i32, i32
  }
  func.func @transform_5(%arg0: i32, %arg1: i32) -> (i32, i32) {
    %c0_i32 = arith.constant 0 : i32
    %c0_i32_0 = arith.constant 0 : i32
    %c0_i32_1 = arith.constant 0 : i32
    return %c0_i32, %c0_i32_0 : i32, i32
  }
  func.func @transform_6(%arg0: i32, %arg1: i32) -> (i32, i32) {
    %c0_i32 = arith.constant 0 : i32
    %c0_i32_0 = arith.constant 0 : i32
    %c0_i32_1 = arith.constant 0 : i32
    return %c0_i32, %c0_i32_0 : i32, i32
  }
  func.func @transform_7(%arg0: i32, %arg1: i32) -> (i32, i32) {
    %c0_i32 = arith.constant 0 : i32
    %c0_i32_0 = arith.constant 0 : i32
    %c0_i32_1 = arith.constant 0 : i32
    return %c0_i32, %c0_i32_0 : i32, i32
  }
  func.func @transform_8(%arg0: i32, %arg1: i32) -> (i32, i32) {
    %c0_i32 = arith.constant 0 : i32
    %c0_i32_0 = arith.constant 0 : i32
    %c0_i32_1 = arith.constant 0 : i32
    return %c0_i32, %c0_i32_0 : i32, i32
  }
  func.func @transform_9(%arg0: i32, %arg1: i32) -> (i32, i32, i32) {
    %c0_i32 = arith.constant 0 : i32
    %c0_i32_0 = arith.constant 0 : i32
    %c0_i32_1 = arith.constant 0 : i32
    return %arg0, %c0_i32, %c0_i32_0 : i32, i32, i32
  }
}

module attributes {stable_mosaic.version = 11 : i64} {
  func.func @kernel(%arg0: i32, %arg1: i32, %arg2: memref<1x16x32xbf16, #tpu.memory_space<vmem>>, %arg3: memref<1x16x32xbf16, #tpu.memory_space<vmem>>, %arg4: memref<1x1x2x16xf32, #tpu.memory_space<vmem>>, %arg5: memref<1x1x1xf32, #tpu.memory_space<vmem>>, %arg6: memref<2x32x256xbf16, #tpu.memory_space<vmem>>, %arg7: memref<1x128xf32, #tpu.memory_space<vmem>>, %arg8: memref<128x128xf32, #tpu.memory_space<vmem>>, %arg9: memref<128x128xf32, #tpu.memory_space<vmem>>, %arg10: memref<1x128xf32, #tpu.memory_space<vmem>>, %arg11: memref<1x1x128xf32, #tpu.memory_space<vmem>>, %arg12: memref<2x128xf32, #tpu.memory_space<vmem>>, %arg13: memref<1x128xf32, #tpu.memory_space<vmem>>) attributes {dimension_semantics = [#tpu.dimension_semantics<parallel>, #tpu.dimension_semantics<arbitrary>], iteration_bounds = array<i64: 2, 2>, scalar_prefetch = 0 : i64, scratch_operands = 2 : i64, tpu.core_type = #tpu.core_type<tc>, window_params = [{transform_indices = @transform_0, window_bounds = array<i64: 1, 16, 32>}, {transform_indices = @transform_1, window_bounds = array<i64: 1, 16, 32>}, {transform_indices = @transform_2, window_bounds = array<i64: 1, 1, 2, 16>}, {transform_indices = @transform_3, window_bounds = array<i64: 1, 1, 1>}, {pipeline_mode = #tpu.pipeline_mode<synchronous>, transform_indices = @transform_4, window_bounds = array<i64: 2, 32, 256>}, {pipeline_mode = #tpu.pipeline_mode<synchronous>, transform_indices = @transform_5, window_bounds = array<i64: 1, 128>}, {pipeline_mode = #tpu.pipeline_mode<synchronous>, transform_indices = @transform_6, window_bounds = array<i64: 128, 128>}, {pipeline_mode = #tpu.pipeline_mode<synchronous>, transform_indices = @transform_7, window_bounds = array<i64: 128, 128>}, {pipeline_mode = #tpu.pipeline_mode<synchronous>, transform_indices = @transform_8, window_bounds = array<i64: 1, 128>}, {transform_indices = @transform_9, window_bounds = array<i64: 1, 1, 128>}]} {
    %c0_i32 = arith.constant 0 : i32
    %0 = arith.cmpi eq, %arg1, %c0_i32 : i32
    %1 = arith.extui %0 : i1 to i32
    %c0_i32_0 = arith.constant 0 : i32
    %2 = arith.cmpi ne, %1, %c0_i32_0 : i32
    scf.if %2 {
      %cst_31 = arith.constant 0.000000e+00 : f32
      %43 = vector.broadcast %cst_31 : f32 to vector<2x128xf32>
      %c0_32 = arith.constant 0 : index
      %c0_33 = arith.constant 0 : index
      %44 = vector.load %arg12[%c0_32, %c0_33] : memref<2x128xf32, #tpu.memory_space<vmem>>, vector<2x128xf32>
      tpu.vector_store %arg12[%c0_32, %c0_33], %43 {strides = array<i32>} : memref<2x128xf32, #tpu.memory_space<vmem>>, vector<2x128xf32>,
      %cst_34 = arith.constant 0.000000e+00 : f32
      %45 = vector.broadcast %cst_34 : f32 to vector<1x128xf32>
      %c0_35 = arith.constant 0 : index
      %c0_36 = arith.constant 0 : index
      %46 = vector.load %arg13[%c0_35, %c0_36] : memref<1x128xf32, #tpu.memory_space<vmem>>, vector<1x128xf32>
      tpu.vector_store %arg13[%c0_35, %c0_36], %45 {strides = array<i32>} : memref<1x128xf32, #tpu.memory_space<vmem>>, vector<1x128xf32>,
    } else {
    }
    %c0 = arith.constant 0 : index
    %c0_1 = arith.constant 0 : index
    %c0_2 = arith.constant 0 : index
    %3 = vector.load %arg2[%c0, %c0_1, %c0_2] : memref<1x16x32xbf16, #tpu.memory_space<vmem>>, vector<1x16x32xbf16>
    %4 = vector.shape_cast %3 : vector<1x16x32xbf16> to vector<16x32xbf16>
    %c0_3 = arith.constant 0 : index
    %c0_4 = arith.constant 0 : index
    %c0_5 = arith.constant 0 : index
    %5 = vector.load %arg6[%c0_3, %c0_4, %c0_5] : memref<2x32x256xbf16, #tpu.memory_space<vmem>>, vector<1x32x256xbf16>
    %6 = vector.shape_cast %5 : vector<1x32x256xbf16> to vector<32x256xbf16>
    %cst = arith.constant dense<0.000000e+00> : vector<16x256xf32>
    %7 = tpu.matmul %4, %6, %cst {dimension_numbers = #tpu.dot_dimension_numbers<[1], [0], [0], [1], [0, 0, 1, 1], [], []>} : vector<16x32xbf16>, vector<32x256xbf16>, vector<16x256xf32> -> vector<16x256xf32>
    %c0_6 = arith.constant 0 : index
    %c0_7 = arith.constant 0 : index
    %c0_8 = arith.constant 0 : index
    %8 = vector.load %arg3[%c0_6, %c0_7, %c0_8] : memref<1x16x32xbf16, #tpu.memory_space<vmem>>, vector<1x16x32xbf16>
    %9 = vector.shape_cast %8 : vector<1x16x32xbf16> to vector<16x32xbf16>
    %c1 = arith.constant 1 : index
    %c0_9 = arith.constant 0 : index
    %c0_10 = arith.constant 0 : index
    %10 = vector.load %arg6[%c1, %c0_9, %c0_10] : memref<2x32x256xbf16, #tpu.memory_space<vmem>>, vector<1x32x256xbf16>
    %11 = vector.shape_cast %10 : vector<1x32x256xbf16> to vector<32x256xbf16>
    %cst_11 = arith.constant dense<0.000000e+00> : vector<16x256xf32>
    %12 = tpu.matmul %9, %11, %cst_11 {dimension_numbers = #tpu.dot_dimension_numbers<[1], [0], [0], [1], [0, 0, 1, 1], [], []>} : vector<16x32xbf16>, vector<32x256xbf16>, vector<16x256xf32> -> vector<16x256xf32>
    %13 = arith.addf %7, %12 : vector<16x256xf32>
    %14 = vector.extract_strided_slice %13 {offsets = [0, 0], sizes = [16, 128], strides = [1, 1]} : vector<16x256xf32> to vector<16x128xf32>
    %15 = vector.extract_strided_slice %13 {offsets = [0, 128], sizes = [16, 128], strides = [1, 1]} : vector<16x256xf32> to vector<16x128xf32>
    %16 = tpu.iota {dimensions = array<i32: 0>} : vector<16x1xi32>
    %c0_i32_12 = arith.constant 0 : i32
    %17 = vector.broadcast %c0_i32_12 : i32 to vector<16x1xi32>
    %18 = arith.cmpi eq, %16, %17 : vector<16x1xi32>
    %c0_13 = arith.constant 0 : index
    %c0_14 = arith.constant 0 : index
    %19 = vector.load %arg13[%c0_13, %c0_14] : memref<1x128xf32, #tpu.memory_space<vmem>>, vector<1x128xf32>
    %c1_i32 = arith.constant 1 : i32
    %20 = tpu.dynamic_rotate %14 by %c1_i32 dim 0 : vector<16x128xf32>, i32 -> vector<16x128xf32>
    %21 = vector.shape_cast %18 : vector<16x1xi1> to vector<16x1xi1>
    %22 = vector.broadcast %21 : vector<16x1xi1> to vector<16x128xi1>
    %23 = vector.shape_cast %19 : vector<1x128xf32> to vector<1x128xf32>
    %24 = vector.broadcast %23 : vector<1x128xf32> to vector<16x128xf32>
    %25 = arith.select %22, %24, %20 : vector<16x128xi1>, vector<16x128xf32>
    %26 = arith.addf %25, %15 : vector<16x128xf32>
    %c0_15 = arith.constant 0 : index
    %c0_16 = arith.constant 0 : index
    %27 = vector.load %arg7[%c0_15, %c0_16] : memref<1x128xf32, #tpu.memory_space<vmem>>, vector<1x128xf32>
    %28 = vector.broadcast %27 : vector<1x128xf32> to vector<16x128xf32>
    %29 = arith.addf %26, %28 : vector<16x128xf32>
    %cst_17 = arith.constant 0.000000e+00 : f32
    %30 = vector.broadcast %cst_17 : f32 to vector<16x128xf32>
    %31 = arith.maximumf %29, %30 : vector<16x128xf32>
    %32 = vector.extract_strided_slice %14 {offsets = [15, 0], sizes = [1, 128], strides = [1, 1]} : vector<16x128xf32> to vector<1x128xf32>
    %c0_18 = arith.constant 0 : index
    %c0_19 = arith.constant 0 : index
    %33 = vector.load %arg13[%c0_18, %c0_19] : memref<1x128xf32, #tpu.memory_space<vmem>>, vector<1x128xf32>
    tpu.vector_store %arg13[%c0_18, %c0_19], %32 {strides = array<i32>} : memref<1x128xf32, #tpu.memory_space<vmem>>, vector<1x128xf32>,
    %c0_20 = arith.constant 0 : index
    %c0_21 = arith.constant 0 : index
    %34 = vector.load %arg12[%c0_20, %c0_21] : memref<2x128xf32, #tpu.memory_space<vmem>>, vector<2x128xf32>
    %c0_22 = arith.constant 0 : index
    %c0_23 = arith.constant 0 : index
    %c0_24 = arith.constant 0 : index
    %c0_25 = arith.constant 0 : index
    %35 = vector.load %arg4[%c0_22, %c0_23, %c0_24, %c0_25] : memref<1x1x2x16xf32, #tpu.memory_space<vmem>>, vector<1x1x2x16xf32>
    %36 = vector.shape_cast %35 : vector<1x1x2x16xf32> to vector<2x16xf32>
    %cst_26 = arith.constant dense<0.000000e+00> : vector<2x128xf32>
    %37 = tpu.matmul %36, %31, %cst_26 {dimension_numbers = #tpu.dot_dimension_numbers<[1], [0], [0], [1], [0, 0, 1, 1], [], []>} : vector<2x16xf32>, vector<16x128xf32>, vector<2x128xf32> -> vector<2x128xf32>
    %38 = arith.addf %34, %37 : vector<2x128xf32>
    %c0_27 = arith.constant 0 : index
    %c0_28 = arith.constant 0 : index
    %39 = vector.load %arg12[%c0_27, %c0_28] : memref<2x128xf32, #tpu.memory_space<vmem>>, vector<2x128xf32>
    tpu.vector_store %arg12[%c0_27, %c0_28], %38 {strides = array<i32>} : memref<2x128xf32, #tpu.memory_space<vmem>>, vector<2x128xf32>,
    %c1_i32_29 = arith.constant 1 : i32
    %40 = arith.cmpi eq, %arg1, %c1_i32_29 : i32
    %41 = arith.extui %40 : i1 to i32
    %c0_i32_30 = arith.constant 0 : i32
    %42 = arith.cmpi ne, %41, %c0_i32_30 : i32
    scf.if %42 {
      %c0_31 = arith.constant 0 : index
      %c0_32 = arith.constant 0 : index
      %c0_33 = arith.constant 0 : index
      %43 = vector.load %arg5[%c0_31, %c0_32, %c0_33] : memref<1x1x1xf32, #tpu.memory_space<vmem>>, vector<1x1x1xf32>
      %44 = vector.shape_cast %43 : vector<1x1x1xf32> to vector<1x1xf32>
      %c0_34 = arith.constant 0 : index
      %c0_35 = arith.constant 0 : index
      %45 = vector.load %arg12[%c0_34, %c0_35] : memref<2x128xf32, #tpu.memory_space<vmem>>, vector<1x128xf32>
      %c0_36 = arith.constant 0 : index
      %c0_37 = arith.constant 0 : index
      %46 = vector.load %arg8[%c0_36, %c0_37] : memref<128x128xf32, #tpu.memory_space<vmem>>, vector<128x128xf32>
      %cst_38 = arith.constant dense<0.000000e+00> : vector<1x128xf32>
      %47 = tpu.matmul %45, %46, %cst_38 {dimension_numbers = #tpu.dot_dimension_numbers<[1], [0], [0], [1], [0, 0, 1, 1], [], []>} : vector<1x128xf32>, vector<128x128xf32>, vector<1x128xf32> -> vector<1x128xf32>
      %c1_39 = arith.constant 1 : index
      %c0_40 = arith.constant 0 : index
      %48 = vector.load %arg12[%c1_39, %c0_40] : memref<2x128xf32, #tpu.memory_space<vmem>>, vector<1x128xf32>
      %c0_41 = arith.constant 0 : index
      %c0_42 = arith.constant 0 : index
      %49 = vector.load %arg9[%c0_41, %c0_42] : memref<128x128xf32, #tpu.memory_space<vmem>>, vector<128x128xf32>
      %cst_43 = arith.constant dense<0.000000e+00> : vector<1x128xf32>
      %50 = tpu.matmul %48, %49, %cst_43 {dimension_numbers = #tpu.dot_dimension_numbers<[1], [0], [0], [1], [0, 0, 1, 1], [], []>} : vector<1x128xf32>, vector<128x128xf32>, vector<1x128xf32> -> vector<1x128xf32>
      %51 = arith.addf %47, %50 : vector<1x128xf32>
      %c0_44 = arith.constant 0 : index
      %c0_45 = arith.constant 0 : index
      %52 = vector.load %arg10[%c0_44, %c0_45] : memref<1x128xf32, #tpu.memory_space<vmem>>, vector<1x128xf32>
      %53 = vector.broadcast %44 : vector<1x1xf32> to vector<1x128xf32>
      %54 = arith.mulf %53, %52 : vector<1x128xf32>
      %55 = arith.addf %51, %54 : vector<1x128xf32>
      %cst_46 = arith.constant 9.99999971E-10 : f32
      %56 = vector.broadcast %cst_46 : f32 to vector<1x1xf32>
      %57 = arith.maximumf %44, %56 : vector<1x1xf32>
      %58 = vector.broadcast %57 : vector<1x1xf32> to vector<1x128xf32>
      %59 = arith.divf %55, %58 : vector<1x128xf32>
      %c0_47 = arith.constant 0 : index
      %c0_48 = arith.constant 0 : index
      %c0_49 = arith.constant 0 : index
      %60 = vector.load %arg11[%c0_47, %c0_48, %c0_49] : memref<1x1x128xf32, #tpu.memory_space<vmem>>, vector<1x1x128xf32>
      %61 = vector.shape_cast %60 : vector<1x1x128xf32> to vector<1x128xf32>
      %62 = vector.shape_cast %59 : vector<1x128xf32> to vector<1x1x128xf32>
      tpu.vector_store %arg11[%c0_47, %c0_48, %c0_49], %62 {strides = array<i32>} : memref<1x1x128xf32, #tpu.memory_space<vmem>>, vector<1x1x128xf32>,
    } else {
    }
    return
  }
  func.func @transform_0(%arg0: i32, %arg1: i32) -> (i32, i32, i32) {
    %c0_i32 = arith.constant 0 : i32
    %c0_i32_0 = arith.constant 0 : i32
    return %arg0, %arg1, %c0_i32 : i32, i32, i32
  }
  func.func @transform_1(%arg0: i32, %arg1: i32) -> (i32, i32, i32) {
    %c0_i32 = arith.constant 0 : i32
    %c0_i32_0 = arith.constant 0 : i32
    return %arg0, %arg1, %c0_i32 : i32, i32, i32
  }
  func.func @transform_2(%arg0: i32, %arg1: i32) -> (i32, i32, i32, i32) {
    %c0_i32 = arith.constant 0 : i32
    %c0_i32_0 = arith.constant 0 : i32
    %c0_i32_1 = arith.constant 0 : i32
    return %arg0, %arg1, %c0_i32, %c0_i32_0 : i32, i32, i32, i32
  }
  func.func @transform_3(%arg0: i32, %arg1: i32) -> (i32, i32, i32) {
    %c0_i32 = arith.constant 0 : i32
    %c0_i32_0 = arith.constant 0 : i32
    %c0_i32_1 = arith.constant 0 : i32
    return %arg0, %c0_i32, %c0_i32_0 : i32, i32, i32
  }
  func.func @transform_4(%arg0: i32, %arg1: i32) -> (i32, i32, i32) {
    %c0_i32 = arith.constant 0 : i32
    %c0_i32_0 = arith.constant 0 : i32
    %c0_i32_1 = arith.constant 0 : i32
    %c0_i32_2 = arith.constant 0 : i32
    return %c0_i32, %c0_i32_0, %c0_i32_1 : i32, i32, i32
  }
  func.func @transform_5(%arg0: i32, %arg1: i32) -> (i32, i32) {
    %c0_i32 = arith.constant 0 : i32
    %c0_i32_0 = arith.constant 0 : i32
    %c0_i32_1 = arith.constant 0 : i32
    return %c0_i32, %c0_i32_0 : i32, i32
  }
  func.func @transform_6(%arg0: i32, %arg1: i32) -> (i32, i32) {
    %c0_i32 = arith.constant 0 : i32
    %c0_i32_0 = arith.constant 0 : i32
    %c0_i32_1 = arith.constant 0 : i32
    return %c0_i32, %c0_i32_0 : i32, i32
  }
  func.func @transform_7(%arg0: i32, %arg1: i32) -> (i32, i32) {
    %c0_i32 = arith.constant 0 : i32
    %c0_i32_0 = arith.constant 0 : i32
    %c0_i32_1 = arith.constant 0 : i32
    return %c0_i32, %c0_i32_0 : i32, i32
  }
  func.func @transform_8(%arg0: i32, %arg1: i32) -> (i32, i32) {
    %c0_i32 = arith.constant 0 : i32
    %c0_i32_0 = arith.constant 0 : i32
    %c0_i32_1 = arith.constant 0 : i32
    return %c0_i32, %c0_i32_0 : i32, i32
  }
  func.func @transform_9(%arg0: i32, %arg1: i32) -> (i32, i32, i32) {
    %c0_i32 = arith.constant 0 : i32
    %c0_i32_0 = arith.constant 0 : i32
    %c0_i32_1 = arith.constant 0 : i32
    return %arg0, %c0_i32, %c0_i32_0 : i32, i32, i32
  }
}

</mosaic_0001>

<bundles_post_ra>
// kernel: tpu_custom_call.1
= control target key start
LH: loop header
LB: loop body
LE: loop exit
PB: predicated region body
PF: predicated region fallthrough
CT: control target
= control target key end

     0   :  { %s2337_s0 = inlined_call_operand.hbm [shape: bf16[2,32,32], index: 0, kind: input, shape index: {}]   ;;  %s2338_s1 = inlined_call_operand.hbm [shape: bf16[2,32,32], index: 1, kind: input, shape index: {}]   ;;  %s2339_s2 = inlined_call_operand.vmem [shape: f32[2,2,2,16], index: 2, kind: input, shape index: {}]   ;;  %s2340_s3 = inlined_call_operand.vmem [shape: f32[2,1,1], index: 3, kind: input, shape index: {}]   ;;  %s2341_s4 = inlined_call_operand.hbm [shape: bf16[2,32,256], index: 4, kind: input, shape index: {}]   ;;  %s2342_s5 = inlined_call_operand.vmem [shape: f32[1,128], index: 5, kind: input, shape index: {}]   ;;  %s2343_s6 = inlined_call_operand.hbm [shape: f32[128,128], index: 6, kind: input, shape index: {}]   ;;  %s2344_s7 = inlined_call_operand.hbm [shape: f32[128,128], index: 7, kind: input, shape index: {}]   ;;  %s2345_s8 = inlined_call_operand.vmem [shape: f32[1,128], index: 8, kind: input, shape index: {}]   ;;  %s2346_s9 = inlined_call_operand.hbm [shape: f32[2,1,128], index: 9, kind: output, shape index: {}]  }
   0x1   :  { %2359 = sst [smem:[#allocation25_spill]] %s2337_s0 }
   0x2   :  { %2360 = sst [smem:[#allocation26_spill]] %s2339_s2 }
   0x3   :  { %2361 = sst [smem:[#allocation27_spill]] %s2340_s3 }
   0x4   :  { %2362 = sst [smem:[#allocation28_spill]] %s2341_s4 }
   0x5   :  { %2363 = sst [smem:[#allocation29_spill]] %s2342_s5 }
   0x6   :  { %2364 = sst [smem:[#allocation30_spill]] %s2343_s6 }
   0x7   :  { %2365 = sst [smem:[#allocation31_spill]] %s2344_s7 }
   0x8   :  { %2366 = sst [smem:[#allocation32_spill]] %s2345_s8 }
   0x9   :  { %2367 = sst [smem:[#allocation33_spill]] %s2346_s9 }
   0xa   :  { %14 = vsyncpa [#allocation5], 0 }
   0xb   :  { %16 = vsyncpa [#allocation5 + $0x1], 0 }
   0xc   :  { %17 = vsyncpa [#allocation8], 0 }
   0xd   :  { %19 = vsyncpa [#allocation8 + $0x1], 0 }
   0xe   :  { %20 = vsyncpa [#allocation11], 0 }
   0xf   :  { %21 = vsyncpa [#allocation6], 0 }
  0x10   :  { %23 = vsyncpa [#allocation6 + $0x1], 0  ;;  %s1885_s30 = smov 0   ;;  %s1887_s10 = smov 0  }
  0x11   :  { %s1889_s11 = smov 0   ;;  %s1891_s12 = smov 0  }
  0x12   :  { %s1893_s13 = smov 0   ;;  %s1895_s14 = smov 0  }
  0x13   :  { %s1897_s15 = smov 0   ;;  %s1899_s16 = smov 0  }
  0x14   :  { %s1901_s17 = smov 0   ;;  %s1903_s18 = smov 0  }
  0x15   :  { %s1905_s19 = smov 0  }
  0x16 LB: > { %2368 = sst [smem:[#allocation19_spill]] %s1774_s30  ;;  %s1939_s20 = sadd.s32 4294967295, %s1814_s19   ;;  %s1814_s19 = sphi %s1905_s19, %s29_s19   ;;  %s1810_s18 = sphi %s1903_s18, %s2418_s18   ;;  %s1806_s17 = sphi %s1901_s17, %s2417_s17   ;;  %s1802_s16 = sphi %s1899_s16, %s2416_s16   ;;  %s1798_s15 = sphi %s1897_s15, %s2415_s15   ;;  %s1794_s14 = sphi %s1895_s14, %s2414_s14   ;;  %s1790_s13 = sphi %s1893_s13, %s2413_s13   ;;  %s1786_s12 = sphi %s1891_s12, %s2412_s12   ;;  %s1782_s11 = sphi %s1889_s11, %s2411_s11   ;;  %s1778_s10 = sphi %s1887_s10, %s2410_s10   ;;  %s1774_s30 = sphi %s1885_s30, %s2409_s30  }
  0x17   : > { %2369 = sst [smem:[#allocation20_spill]] %s1798_s15  ;;  %s1157_s21 = sadd.s32 4294967294, %s1814_s19  }
  0x18   : > { %2370 = sst [smem:[#allocation21_spill]] %s1802_s16  ;;  %p63_p0 = scmp.ne.s32.totalorder %s1790_s13, %s1786_s12 }
  0x19   : > { %p2352_p1 = scmp.eq.s32.totalorder %s1939_s20, 0  ;;  %p273_p2 = scmp.ne.s32.totalorder %s1782_s11, %s1778_s10 }
  0x1a   : > { %p274_p4 = scmp.eq.s32.totalorder %s1939_s20, 3  ;;  %p279_p5 = scmp.ne.s32.totalorder %s1778_s10, %s1774_s30 }
  0x1b   : > { %p1949_p3 = por %p2352_p1, %p63_p0  ;;  %p280_p6 = scmp.eq.s32.totalorder %s1157_s21, 3 }
  0x1c   : > { %p1956_p7 = por %p274_p4, %p273_p2  ;;  %p1158_p8 = scmp.ge.s32.totalorder %s1814_s19, 1 }
  0x1d   : > { %s2371_s23 = scalar_select %p1949_p3, 1, 0 }
  0x1e   : > { %s2372_s24 = scalar_select %p1956_p7, 1, 0 }
  0x1f   : > { %p1961_p9 = por %p280_p6, %p279_p5  ;;  %p287_p10 = scmp.lt.s32.totalorder %s1814_s19, 5 }
  0x20   : > { %2373 = sst [smem:[#allocation22_spill]] %s2372_s24  ;;  %s1816_s27 = smov [#allocation9]  }
  0x21   : > { %s2374_s25 = scalar_select %p1961_p9, 1, 0 }
  0x22   : > { %p1966_p11 = pnand %p1158_p8, %p287_p10  ;;  %s299_s28 = sshll.u32 %s1816_s27, 4  ;;  %s1970_s28 = int_to_ptr.vmem [resolvable:$true] %s299_s28 }
  0x23   : > { %2375 = sst [smem:[#allocation23_spill]] %s2374_s25  ;;  %s1817_s12 = smov [#allocation10]  }
  0x24   : > { %s2376_s26 = scalar_select %p1966_p11, 1, 0 }
  0x25   : > { %p1386_p12 = pneg %p1966_p11  ;;  %s315_s21 = sshll.u32 %s1817_s12, 4  ;;  %s1980_s21 = int_to_ptr.vmem [resolvable:$true] %s315_s21 }
  0x26   : > { %s1818_s22 = smov [#allocation12]   ;;  %s2378_s4 = sld [smem:[#allocation28_spill]] }
  0x27   : > { %p1976_p13 = pnand %p1386_p12, %p2352_p1  ;;  %s1982_s25 = sshll.u32 %s1818_s22, 4  ;;  %s329_s25 = int_to_ptr.vmem [resolvable:$true] %s1982_s25 }
  0x29   : > { %p1992_p2 = pneg %p1976_p13 }
  0x2c   : > { %s1536_s27 = scalar_lea.hbm %s2378_s4, 1024 }
  0x2d   : > { %p1537_p0 = scmp.ne.s32.totalorder %s2378_s4, %s1536_s27  ;;  %p1543_p6 = scmp.lt.u32.totalorder %s1536_s27, %s2378_s4 }
  0x2f   : > { %p1539_p4 = pnand %p1992_p2, %p1537_p0 }
  0x31   : > { %p1540_p5 = pneg %p1539_p4 }
  0x33   : > { %p1545_p8 = pnand %p1543_p6, %p1540_p5 }
  0x35   : > { %1548 = shalt.err (!%p1545_p8)
}
  0x36   : > { %s1549_s8 = scalar_lea.vmem %s1970_s28, 1024  ;;  %p1557_p9 = scmp.lt.s32.totalorder %s1970_s28, %s1970_s28 }
  0x37   : > { %p1550_p10 = scmp.ne.s32.totalorder %s1970_s28, %s1549_s8  ;;  %p1558_p7 = scmp.lt.s32.totalorder %s1549_s8, %s1549_s8 }
  0x39   : > { %p1552_p12 = pnand %p1550_p10, %p1992_p2  ;;  %p1559_p0 = por %p1558_p7, %p1557_p9 }
  0x3b   : > { %p1553_p1 = pneg %p1552_p12 }
  0x3d   : > { %p1560_p4 = pnand %p1559_p0, %p1553_p1 }
  0x3f   : > { %1563 = shalt.err (!%p1560_p4)
}
  0x40   : > { %s1819_s9 = smov 128   ;;  %s1820_s30 = smov 8  }
  0x41   : > { %1389 = dma.hbm_to_vmem [thread:$0]  (!%p1976_p13), %s2378_s4, 1024, %s1970_s28, [#allocation8], %s1819_s9, %s1819_s9, %s1820_s30  }
  0x42   : > { %s2380_s6 = sld [smem:[#allocation30_spill]] }
  0x48   : > { %s1564_s8 = scalar_lea.hbm %s2380_s6, 2048 }
  0x49   : > { %p1565_p1 = scmp.ne.s32.totalorder %s2380_s6, %s1564_s8  ;;  %p1571_p5 = scmp.lt.u32.totalorder %s1564_s8, %s2380_s6 }
  0x4b   : > { %p1567_p7 = pnand %p1565_p1, %p1992_p2 }
  0x4d   : > { %p1568_p9 = pneg %p1567_p7 }
  0x4f   : > { %p1573_p6 = pnand %p1571_p5, %p1568_p9 }
  0x51   : > { %1576 = shalt.err (!%p1573_p6)
}
  0x52   : > { %s1577_s28 = scalar_lea.vmem %s1980_s21, 2048  ;;  %p1585_p0 = scmp.lt.s32.totalorder %s1980_s21, %s1980_s21 }
  0x53   : > { %p1578_p8 = scmp.ne.s32.totalorder %s1980_s21, %s1577_s28  ;;  %p1586_p4 = scmp.lt.s32.totalorder %s1577_s28, %s1577_s28 }
  0x55   : > { %p1580_p10 = pnand %p1578_p8, %p1992_p2  ;;  %p1587_p1 = por %p1586_p4, %p1585_p0 }
  0x57   : > { %p1581_p12 = pneg %p1580_p10 }
  0x59   : > { %p1588_p7 = pnand %p1587_p1, %p1581_p12 }
  0x5b   : > { %1591 = shalt.err (!%p1588_p7)
}
  0x5c   : > { %1392 = dma.hbm_to_vmem [thread:$0]  (!%p1976_p13), %s2380_s6, 2048, %s1980_s21, [#allocation11], %s1819_s9, %s1819_s9, %s1820_s30  }
  0x5d   : > { %s2381_s7 = sld [smem:[#allocation31_spill]] }
  0x63   : > { %s1592_s24 = scalar_lea.hbm %s2381_s7, 2048 }
  0x64   : > { %p1593_p9 = scmp.ne.s32.totalorder %s2381_s7, %s1592_s24  ;;  %p1599_p8 = scmp.lt.u32.totalorder %s1592_s24, %s2381_s7 }
  0x66   : > { %p1595_p5 = pnand %p1593_p9, %p1992_p2 }
  0x68   : > { %p1596_p6 = pneg %p1595_p5 }
  0x6a   : > { %p1601_p10 = pnand %p1599_p8, %p1596_p6 }
  0x6c   : > { %1604 = shalt.err (!%p1601_p10)
}
  0x6d   : > { %s1605_s28 = scalar_lea.vmem %s329_s25, 2048  ;;  %p1613_p1 = scmp.lt.s32.totalorder %s329_s25, %s329_s25 }
  0x6e   : > { %p1606_p12 = scmp.ne.s32.totalorder %s329_s25, %s1605_s28  ;;  %p1614_p7 = scmp.lt.s32.totalorder %s1605_s28, %s1605_s28 }
  0x70   : > { %p1608_p0 = pnand %p1606_p12, %p1992_p2  ;;  %p1615_p3 = por %p1614_p7, %p1613_p1 }
  0x72   : > { %p1609_p4 = pneg %p1608_p0 }
  0x74   : > { %p1616_p11 = pnand %p1615_p3, %p1609_p4 }
  0x76   : > { %1619 = shalt.err (!%p1616_p11)
}
  0x77   : > { %1395 = dma.hbm_to_vmem [thread:$0]  (!%p1976_p13), %s2381_s7, 2048, %s329_s25, [#allocation11], %s1819_s9, %s1819_s9, %s1820_s30  }
  0x78   : > { %s38_s5 = sadd.s32 1, %s1806_s17  ;;  %s41_s29 = sadd.s32 1, %s1810_s18 }
  0x79   : > { %p39_p3 = scmp.ge.s32.totalorder %s38_s5, 2  ;;  %s50_s3 = sadd.s32 1, %s1794_s14 }
  0x7a   : > { %p57_p11 = scmp.ne.s32.totalorder %s1794_s14, %s1790_s13  ;;  %p58_p2 = scmp.eq.s32.totalorder %s1814_s19, 0 }
  0x7b   : > { %s2420_s5 = smov (%p39_p3, %s38_s5), 0  ;;  %s2422_s29 = smov (!%p39_p3, %s41_s29), %s1810_s18 }
  0x7c   : > { %s46_s15 = ssub.s32 %s1806_s17, %s2420_s5  ;;  %p43_p9 = scmp.ge.s32.totalorder %s2422_s29, 2 }
  0x7d   : > { %p1410_p5 = scmp.lt.s32.totalorder %s1814_s19, 4  ;;  %p2076_p13 = por %p58_p2, %p57_p11 }
  0x7e   : > { %s345_s9 = sand.u32 1, %s1794_s14   ;;  %s2424_s29 = smov (%p43_p9, %s2422_s29), 0 }
  0x7f   : > { %2383 = sst [smem:[#allocation24_spill]] %s2424_s29  ;;  %s2083_s30 = sshll.u32 %s345_s9, 3 }
  0x80   : > { %s45_s16 = ssub.s32 %s1810_s18, %s2424_s29  ;;  %s1164_s27 = sshll.u32 %s1806_s17, 1 }
  0x81   : > { %s47_s24 = sor.u32 %s46_s15, %s45_s16  ;;  %p261_p6 = scmp.eq.s32.totalorder %s45_s16, 0 }
  0x82   : > { %p48_p8 = scmp.eq.s32.totalorder %s47_s24, 0  ;;  %s2384_s12 = sadd.s32 1, %s1782_s11 }
  0x83   : > { %s2091_s22 = scalar_select %p261_p6, %s1782_s11, %s2384_s12  }
  0x84   : > { %s2094_s8 = scalar_select %p48_p8, %s1794_s14, %s50_s3  }
  0x85   : > { %s1165_s28 = sshll.u32 %s1810_s18, 2  ;;  %s349_s21 = scalar_lea.vmem [#allocation4], %s2083_s30 }
  0x86   : > { %s358_s2 = sshll.u32 %s349_s21, 4  ;;  %s2098_s4 = sadd.s32 %s1165_s28, %s1164_s27  ;;  %s2100_s2 = int_to_ptr.vmem [resolvable:$true] %s358_s2 }
  0x87   : > { %s1166_s6 = sshll.u32 %s2098_s4, 6  ;;  %p2107_p10 = pnand %p1410_p5, %p2076_p13 }
  0x88   : > { %s2386_s0 = sld [smem:[#allocation25_spill]]  ;;  %s2118_s27 = scalar_lea.sflag [#allocation5], %s345_s9 }
  0x89   : > { %p1622_p0 = pneg %p2107_p10 }
  0x8e   : > { %s2116_s24 = scalar_lea.hbm %s2386_s0, %s1166_s6  ;;  %s1625_s21 = scalar_lea.hbm %s2386_s0, 512 }
  0x8f   : > { %s1620_s25 = scalar_lea.hbm %s2116_s24, 128  ;;  %p1626_p7 = scmp.lt.u32.totalorder %s2116_s24, %s2386_s0 }
  0x90   : > { %p1621_p12 = scmp.ne.s32.totalorder %s2116_s24, %s1620_s25  ;;  %p1627_p3 = scmp.lt.u32.totalorder %s1625_s21, %s1620_s25 }
  0x91   : > { %p1629_p2 = scmp.lt.u32.totalorder %s1620_s25, %s2116_s24 }
  0x92   : > { %p1623_p4 = pnand %p1622_p0, %p1621_p12  ;;  %p1628_p11 = por %p1627_p3, %p1626_p7 }
  0x94   : > { %p1624_p1 = pneg %p1623_p4  ;;  %p1630_p9 = por %p1629_p2, %p1628_p11 }
  0x96   : > { %p1631_p5 = pnand %p1630_p9, %p1624_p1 }
  0x98   : > { %1634 = shalt.err (!%p1631_p5)
}
  0x99   : > { %s1635_s9 = scalar_lea.vmem %s2100_s2, 128  ;;  %s1821_s12 = smov [#allocation4]  }
  0x9a   : > { %p1636_p13 = scmp.ne.s32.totalorder %s2100_s2, %s1635_s9  ;;  %s1640_s28 = sshll.u32 %s1821_s12, 4  ;;  %s1641_s28 = int_to_ptr.vmem [resolvable:$false] %s1640_s28 }
  0x9b   : > { %s1642_s16 = scalar_lea.vmem %s1641_s28, 256  ;;  %p1643_p12 = scmp.lt.s32.totalorder %s2100_s2, %s1641_s28 }
  0x9c   : > { %p1638_p6 = pnand %p1636_p13, %p1622_p0  ;;  %p1644_p4 = scmp.lt.s32.totalorder %s1642_s16, %s1635_s9 }
  0x9e   : > { %p1639_p8 = pneg %p1638_p6  ;;  %p1645_p7 = por %p1644_p4, %p1643_p12 }
  0xa0   : > { %p1646_p3 = pnand %p1645_p7, %p1639_p8 }
  0xa2   : > { %1649 = shalt.err (!%p1646_p3)
}
  0xa3   : > { %s1822_s25 = smov 64   ;;  %s1823_s21 = smov 4  }
  0xa4   : > { %1399 = dma.hbm_to_vmem [thread:$0]  (!%p2107_p10), %s2116_s24, 128, %s2100_s2, %s2118_s27, %s1822_s25, %s1822_s25, %s1823_s21  }
  0xa5   : > { %s2154_s12 = scalar_lea.hbm %s2338_s1, %s1166_s6  ;;  %s372_s28 = scalar_lea.vmem [#allocation7], %s2083_s30 }
  0xa6   : > { %s381_s16 = sshll.u32 %s372_s28, 4  ;;  %s368_s0 = sand.u32 1, %s1814_s19   ;;  %s2158_s16 = int_to_ptr.vmem [resolvable:$true] %s381_s16 }
  0xa7   : > { %s2160_s7 = scalar_lea.sflag [#allocation8], %s368_s0  ;;  %s1650_s29 = scalar_lea.hbm %s2154_s12, 128 }
  0xa8   : > { %p1651_p1 = scmp.ne.s32.totalorder %s2154_s12, %s1650_s29  ;;  %s1655_s2 = scalar_lea.hbm %s2338_s1, 512 }
  0xa9   : > { %p1656_p9 = scmp.lt.u32.totalorder %s2154_s12, %s2338_s1  ;;  %p1657_p5 = scmp.lt.u32.totalorder %s1655_s2, %s1650_s29 }
  0xaa   : > { %p1653_p11 = pnand %p1651_p1, %p1622_p0  ;;  %p1659_p6 = scmp.lt.u32.totalorder %s1650_s29, %s2154_s12 }
  0xab   : > { %p1658_p13 = por %p1657_p5, %p1656_p9 }
  0xac   : > { %p1654_p2 = pneg %p1653_p11 }
  0xad   : > { %p1660_p8 = por %p1659_p6, %p1658_p13 }
  0xaf   : > { %p1661_p12 = pnand %p1660_p8, %p1654_p2 }
  0xb1   : > { %1664 = shalt.err (!%p1661_p12)
}
  0xb2   : > { %s1665_s0 = scalar_lea.vmem %s2158_s16, 128  ;;  %s1824_s30 = smov [#allocation7]  }
  0xb3   : > { %p1666_p4 = scmp.ne.s32.totalorder %s2158_s16, %s1665_s0  ;;  %s1670_s3 = sshll.u32 %s1824_s30, 4  ;;  %s1671_s3 = int_to_ptr.vmem [resolvable:$false] %s1670_s3 }
  0xb4   : > { %s1672_s9 = scalar_lea.vmem %s1671_s3, 256  ;;  %p1673_p1 = scmp.lt.s32.totalorder %s2158_s16, %s1671_s3 }
  0xb5   : > { %p1668_p7 = pnand %p1666_p4, %p1622_p0  ;;  %p1674_p11 = scmp.lt.s32.totalorder %s1672_s9, %s1665_s0 }
  0xb7   : > { %p1669_p3 = pneg %p1668_p7  ;;  %p1675_p9 = por %p1674_p11, %p1673_p1 }
  0xb9   : > { %p1676_p5 = pnand %p1675_p9, %p1669_p3 }
  0xbb   : > { %1679 = shalt.err (!%p1676_p5)
}
  0xbc   : > { %1402 = dma.hbm_to_vmem [thread:$0]  (!%p2107_p10), %s2154_s12, 128, %s2158_s16, %s2160_s7, %s1822_s25, %s1822_s25, %s1823_s21  }
  0xbd   : > { %p2387_p0 = scmp.ne.s32.totalorder %s2376_s26, 0 }
  0xbe   : > { %s412_s29 = sand.u32 (!%p2387_p0), 1, %s1790_s13   ;;  %p2388_p2 = scmp.ne.s32.totalorder (!%p2387_p0), %s2371_s23, 0 }
  0xbf   : > { %410 = sbr.rel (%p2387_p0) target bundleno = 935 (0x3a7), region = 56  ;;  %s2192_s28 = sshll.u32 (!%p2387_p0), %s412_s29, 3 }
  0xc0   : > { %s413_s4 = scalar_lea.sflag (!%p2387_p0), [#allocation5], %s412_s29  ;;  %s416_s6 = scalar_lea.vmem (!%p2387_p0), [#allocation4], %s2192_s28 }
  0xc6   : > { %1753 = dma.done.wait (%p2388_p2), %s413_s4, 128  }
  0xc7   : > { %1755 = vsyncadd (%p2388_p2), %s413_s4, 4294967168  ;;  %s421_s7 = sand.u32 1, %s1939_s20   ;;  %s425_s26 = scalar_lea.vmem [#allocation7], %s2192_s28 }
  0xc8   : > { %s422_s15 = scalar_lea.sflag [#allocation8], %s421_s7 }
  0xc9   : > { %1757 = dma.done.wait (%p2388_p2), %s422_s15, 128  }
  0xca   : > { %1759 = vsyncadd (%p2388_p2), %s422_s15, 4294967168  ;;  %p2389_p10 = scmp.eq.s32.totalorder %s1939_s20, 0 }
  0xcc   : > { %1761 = dma.done.wait (%p2389_p10), [#allocation8], 1024   ;;  %p2390_p13 = pmov %p2389_p10 }
  0xcd   : > { %p2391_p6 = pmov %p2389_p10 }
  0xce   : > { %1763 = vsyncadd (%p2390_p13), [#allocation8], 4294966272 }
  0xcf   : > { %1765 = dma.done.wait (%p2391_p6), [#allocation11], 4096   ;;  %p2392_p8 = pmov %p2391_p6 }
  0xd0   : > { %s2393_s25 = sld [smem:[#allocation21_spill]]  ;;  %s2394_s21 = sld [smem:[#allocation20_spill]] }
  0xd1   : > { %1767 = vsyncadd (%p2392_p8), [#allocation11], 4294963200  ;;  %s485_s23 = sand.u32 1, %s1778_s10   ;;  %s2395_s27 = sld [smem:[#allocation27_spill]] }
  0xd2   : > { %s2396_s29 = sld [smem:[#allocation26_spill]]  ;;  %s2232_s7 = scalar_lea.vmem [#allocation13], %s485_s23 }
  0xd6   : > { %p489_p12 = scmp.lt.s32.totalorder %s2393_s25, 1  ;;  %p491_p4 = scmp.lt.s32.totalorder %s2394_s21, 1 }
  0xd7   : > { %p1179_p7 = scmp.ne.s32.totalorder %s2394_s21, 0 }
  0xd8   : > { %s2426_s25 = smov (!%p489_p12, %s2393_s25), 1  ;;  %v1825_v0 = vmov (!%p1179_p7), 0.0  }
  0xd9   : > { %s492_s12 = scalar_select %p491_p4, %s2394_s21, 1 }
  0xda   : > { %s1177_s16 = sshll.u32 %s2426_s25, 1  ;;  %s499_s20 = scalar_lea.vmem %s2395_s27, %s2426_s25  ;;  %505 = vst [vmem:[#allocation2] sm:$0x3] (!%p1179_p7), %v1825_v0  ;;  %506 = vst [vmem:[#allocation3] sm:$0x1] (!%p1179_p7), %v1825_v0 }
  0xdb   : > { %s494_s0 = sadd.s32 %s1177_s16, %s492_s12  ;;  %504 = sbr.rel (%p1179_p7) target bundleno = 226 (0xe2), region = 80 }
  0xdc   : > { %s1178_s30 = sshll.u32 %s494_s0, 1 }
  0xdd   : > { %s2228_s4 = scalar_lea.vmem %s2396_s29, %s1178_s30 }
  0xe2 PF: > { %v1519_v1 = vld [vmem:[#allocation9 + $0x24] ss:$8 sps:$4 sm:$0xff]   ;;  %v1826_v3 = vmov 0   ;;  %v1523_v4 = vld [vmem:[#allocation9 + $0x20] ss:$8 sps:$4 sm:$0xff]   ;;  %v1531_v10 = vld [vmem:[%s425_s26] sm:$0xff]   ;;  %v663_v14 = vlaneseq }
  0xe3   : > { %v1521_v2 = vld [vmem:[#allocation9 + $0x4] ss:$8 sps:$4 sm:$0xff]   ;;  %581 = vmatprep.mubr.bf16.mxu1 %v1826_v3  ;;  %652 = vmatprep.mubr.bf16.mxu0 %v1826_v3  ;;  %v1524_v5 = vld [vmem:[#allocation9] ss:$8 sps:$4 sm:$0xff]   ;;  %v1525_v6 = vld [vmem:[#allocation9 + $0x34] ss:$8 sps:$4 sm:$0xff]  }
  0xe4   : > { %549 = vmatprep.subr.bf16.mxu1 %v1519_v1  ;;  %620 = vmatprep.subr.bf16.mxu0 %v1521_v2  ;;  %v1527_v7 = vld [vmem:[#allocation9 + $0x14] ss:$8 sps:$4 sm:$0xff]   ;;  %v1529_v8 = vld [vmem:[#allocation9 + $0x30] ss:$8 sps:$4 sm:$0xff]   ;;  %v1532_v11 = vld [vmem:[%s416_s6] sm:$0xff]   ;;  %vm545_vm0 = vcmask 261120  }
  0xe5   : > { %550 = vmatpush1.bf16.msra.mxu1 %v1523_v4  ;;  %621 = vmatpush1.bf16.msra.mxu0 %v1524_v5  ;;  %v1530_v9 = vld [vmem:[#allocation9 + $0x10] ss:$8 sps:$4 sm:$0xff]   ;;  %v1827_v12 = vmov 0.0|0.0   ;;  %vm1828_vm1 = vmmov 0   ;;  %v1829_v13 = vmov 0.0   ;;  %v2239_v17 = vshrl.u32 %v663_v14, 7 }
  0xe6   : > { %551 = vmatprep.subr.bf16.mxu1 %v1525_v6  ;;  %622 = vmatprep.subr.bf16.mxu0 %v1527_v7  ;;  %v1192_v24 = vld [vmem:[#allocation3] ss:$0 sm:$0xff]  ;;  %s2397_s15 = sld [smem:[#allocation29_spill]]  ;;  %v701_v42 = vld [vmem:[%s2228_s4] sm:$0x3]  ;;  %vm702_vm4 = vcmask 130048  }
  0xe7   : > { %vm671_vm2 = vcmp.lt.s32.totalorder %v2239_v17, 1  ;;  %vm666_vm3 = vcmp.eq.s32.totalorder %v2239_v17, 0  ;;  %v700_v43 = vld [vmem:[#allocation2] sm:$0x3]  ;;  %s2398_s26 = sld [smem:[#allocation20_spill]] }
  0xe9   : > { %552 = vmatpush1.bf16.msra.mxu1 %v1529_v8  ;;  %623 = vmatpush1.bf16.msra.mxu0 %v1530_v9 }
  0xea   : > { %1313 = vmatprep.subr.bf16.mxu1 %v1827_v12 }
  0xec   : > { %1185 = vmatmul.mubr.msk.bf16.vlgmr.msra.gmra.mrb[0].mxu1 %vm545_vm0, %v1531_v10  ;;  %1191 = vmatmul.mubr.msk.bf16.vlgmr.msra.gmra.mrb[0].mxu0 %vm545_vm0, %v1532_v11  ;;  %v1193_v33 = vld [vmem:[%s2397_s15] ss:$0 sm:$0xff] }
  0xed   : > { %1240 = vmatprep.mubr.msk.f32.mxu1 %vm1828_vm1, %v1829_v13  ;;  %p1195_p3 = scmp.ne.s32.totalorder %s2398_s26, 1 }
  0xee   : > { %v801_v47 = vld [vmem:[#allocation12] sm:$0xff] (!%p1195_p3)  ;;  %v802_v48 = vld [vmem:[#allocation12 + $0x8] sm:$0xff] (!%p1195_p3)  ;;  %v1830_v50 = vmov (!%p1195_p3), 0.0|0.0   ;;  %v803_v53 = vld [vmem:[#allocation12 + $0x10] sm:$0xff] (!%p1195_p3)  ;;  %vm1831_vm5 = vmmov (!%p1195_p3), 0   ;;  %v1832_v58 = vmov (!%p1195_p3), 0.0  }
  0xef   : > { %v784_v49 = vld [vmem:[#allocation10] sm:$0xff] (!%p1195_p3)  ;;  %1316 = vmatprep.subr.bf16.mxu0 (!%p1195_p3), %v1830_v50  ;;  %v1317_v51 = vpack.c.bf16 (!%p1195_p3), %v802_v48, %v801_v47  ;;  %v785_v52 = vld [vmem:[#allocation10 + $0x8] sm:$0xff] (!%p1195_p3)  ;;  %v804_v54 = vld [vmem:[#allocation12 + $0x18] sm:$0xff] (!%p1195_p3)  ;;  %1275 = vmatprep.mubr.msk.f32.mxu0 (!%p1195_p3), %vm1831_vm5, %v1832_v58  ;;  %v1833_v60 = vmov (!%p1195_p3), 0   ;;  %s2400_s24 = sld [smem:[#allocation32_spill]] (!%p1195_p3) }
  0xf0   : > { %v1341_v55 = vpack.c.bf16 (!%p1195_p3), %v785_v52, %v784_v49  ;;  %v786_v56 = vld [vmem:[#allocation10 + $0x10] sm:$0xff] (!%p1195_p3)  ;;  %v787_v57 = vld [vmem:[#allocation10 + $0x18] sm:$0xff] (!%p1195_p3)  ;;  %v1320_v59 = vpack.c.bf16 (!%p1195_p3), %v804_v54, %v803_v53  ;;  %1533 = vset.pattern.permute.xlu0 (!%p1195_p3), %v1833_v60  ;;  %v805_v62 = vld [vmem:[#allocation12 + $0x20] sm:$0xff] (!%p1195_p3) }
  0xf1   : > { %1318 = vmatpush3.bf16.msra.mxu0 (!%p1195_p3), %v1317_v51  ;;  %v1344_v61 = vpack.c.bf16 (!%p1195_p3), %v787_v57, %v786_v56  ;;  %v806_v63 = vld [vmem:[#allocation12 + $0x28] sm:$0xff] (!%p1195_p3)  ;;  %v788_v0 = vld [vmem:[#allocation10 + $0x20] sm:$0xff] (!%p1195_p3)  ;;  %v807_v4 = vld [vmem:[#allocation12 + $0x30] sm:$0xff] (!%p1195_p3) }
  0xf2   : > { %1319 = vmatprep.subr.bf16.mxu0 (!%p1195_p3), %v1830_v50  ;;  %v789_v1 = vld [vmem:[#allocation10 + $0x28] sm:$0xff] (!%p1195_p3)  ;;  %v1323_v2 = vpack.c.bf16 (!%p1195_p3), %v806_v63, %v805_v62  ;;  %v808_v5 = vld [vmem:[#allocation12 + $0x38] sm:$0xff] (!%p1195_p3)  ;;  %v790_v6 = vld [vmem:[#allocation10 + $0x30] sm:$0xff] (!%p1195_p3) }
  0xf3   : > { %v1347_v3 = vpack.c.bf16 (!%p1195_p3), %v789_v1, %v788_v0  ;;  %v791_v7 = vld [vmem:[#allocation10 + $0x38] sm:$0xff] (!%p1195_p3)  ;;  %v1326_v8 = vpack.c.bf16 (!%p1195_p3), %v808_v5, %v807_v4  ;;  %v809_v11 = vld [vmem:[#allocation12 + $0x40] sm:$0xff] (!%p1195_p3)  ;;  %v810_v12 = vld [vmem:[#allocation12 + $0x48] sm:$0xff] (!%p1195_p3) }
  0xf4   : > { %v782_v9 = vld [vmem:[%s499_s20] sm:$0x1] (!%p1195_p3)  ;;  %v1350_v10 = vpack.c.bf16 (!%p1195_p3), %v791_v7, %v790_v6  ;;  %v792_v14 = vld [vmem:[#allocation10 + $0x40] sm:$0xff] (!%p1195_p3) }
  0xf5   : > { %1321 = vmatpush3.bf16.msra.mxu0 (!%p1195_p3), %v1320_v59  ;;  %v969_v13 = vmax.f32 (!%p1195_p3), %v782_v9, 1e-09 }
  0xf6   : > { %1322 = vmatprep.subr.bf16.mxu0 (!%p1195_p3), %v1830_v50 }
  0xf7   : > { %972 = vperm.xlu0 (!%p1195_p3), %1533, %v969_v13  }
  0xf9   : > { %1324 = vmatpush3.bf16.msra.mxu0 (!%p1195_p3), %v1323_v2 }
  0xfa   : > { %1325 = vmatprep.subr.bf16.mxu0 (!%p1195_p3), %v1830_v50 }
  0xfb   : > { %960 = vperm.xlu0 (!%p1195_p3), %1533, %v782_v9  }
  0xfd   : > { %1327 = vmatpush3.bf16.msra.mxu0 (!%p1195_p3), %v1326_v8 }
  0xfe   : > { %1328 = vmatprep.subr.bf16.mxu0 (!%p1195_p3), %v1830_v50 }
 0x1bf   : > { %v583_v15 = vpop.f32.mrb[0].mxu1  ;;  %v654_v16 = vpop.f32.mrb[0].mxu0 }
 0x1c0   : > { %v655_v18 = vadd.f32 %v654_v16, %v583_v15  ;;  %v585_v19 = vpop.f32.mrb[1].mxu1  ;;  %v656_v20 = vpop.f32.mrb[1].mxu0  ;;  %v793_v15 = vld [vmem:[#allocation10 + $0x48] sm:$0xff] (!%p1195_p3)  ;;  %v1329_v16 = vpack.c.bf16 (!%p1195_p3), %v810_v12, %v809_v11 }
 0x1c1   : > { %v657_v21 = vadd.f32 %v656_v20, %v585_v19  ;;  %v587_v22 = vpop.f32.mrb[2].mxu1  ;;  %v658_v23 = vpop.f32.mrb[2].mxu0  ;;  %v811_v19 = vld [vmem:[#allocation12 + $0x50] sm:$0xff] (!%p1195_p3)  ;;  %v812_v20 = vld [vmem:[#allocation12 + $0x58] sm:$0xff] (!%p1195_p3) }
 0x1c2   : > { %v659_v25 = vadd.f32 %v658_v23, %v587_v22  ;;  %v589_v26 = vpop.f32.mrb[3].mxu1  ;;  %v660_v27 = vpop.f32.mrb[3].mxu0  ;;  %v669_v29 = vrot.slane %v655_v18, 7  ;;  %v1353_v18 = vpack.c.bf16 (!%p1195_p3), %v793_v15, %v792_v14  ;;  %v795_v22 = vld [vmem:[#allocation10 + $0x58] sm:$0xff] (!%p1195_p3)  ;;  %1330 = vmatpush3.bf16.msra.mxu0 (!%p1195_p3), %v1329_v16  ;;  %v1332_v23 = vpack.c.bf16 (!%p1195_p3), %v812_v20, %v811_v19 }
 0x1c3   : > { %v661_v28 = vadd.f32 %v660_v27, %v589_v26  ;;  %1331 = vmatprep.subr.bf16.mxu0 (!%p1195_p3), %v1830_v50  ;;  %v814_v26 = vld [vmem:[#allocation12 + $0x68] sm:$0xff] (!%p1195_p3)  ;;  %v796_v27 = vld [vmem:[#allocation10 + $0x60] sm:$0xff] (!%p1195_p3) }
 0x1c4   : > { %v670_v30 = vrot.slane %v659_v25, 7  ;;  %699 = vst [vmem:[#allocation3 - $0x7] sm:$0x80] %v659_v25  ;;  %v813_v25 = vld [vmem:[#allocation12 + $0x60] sm:$0xff] (!%p1195_p3) }
 0x1c6   : > { %v673_v31 = vsel %vm671_vm2, %v670_v30, %v669_v29  ;;  %v672_v32 = vsel %vm671_vm2, %v669_v29, %v670_v30  ;;  %1333 = vmatpush3.bf16.msra.mxu0 (!%p1195_p3), %v1332_v23  ;;  %v1335_v29 = vpack.c.bf16 (!%p1195_p3), %v814_v26, %v813_v25 }
 0x1c7   : > { %v684_v34 = vsel %vm666_vm3, %v1192_v24, %v673_v31  ;;  %v687_v35 = vadd.f32 %v672_v32, %v661_v28  ;;  %v797_v28 = vld [vmem:[#allocation10 + $0x68] sm:$0xff] (!%p1195_p3)  ;;  %1334 = vmatprep.subr.bf16.mxu0 (!%p1195_p3), %v1830_v50  ;;  %v815_v31 = vld [vmem:[#allocation12 + $0x70] sm:$0xff] (!%p1195_p3)  ;;  %v816_v32 = vld [vmem:[#allocation12 + $0x78] sm:$0xff] (!%p1195_p3) }
 0x1c8   : > { %v686_v36 = vadd.f32 %v684_v34, %v657_v21  ;;  %v794_v21 = vld [vmem:[#allocation10 + $0x50] sm:$0xff] (!%p1195_p3)  ;;  %v1359_v30 = vpack.c.bf16 (!%p1195_p3), %v797_v28, %v796_v27  ;;  %v799_v34 = vld [vmem:[#allocation10 + $0x78] sm:$0xff] (!%p1195_p3) }
 0x1c9   : > { %v696_v37 = vadd.f32 %v1193_v33, %v687_v35  ;;  %v1356_v24 = vpack.c.bf16 (!%p1195_p3), %v795_v22, %v794_v21  ;;  %v1338_v35 = vpack.c.bf16 (!%p1195_p3), %v816_v32, %v815_v31 }
 0x1ca   : > { %v695_v38 = vadd.f32 %v1193_v33, %v686_v36  ;;  %v798_v33 = vld [vmem:[#allocation10 + $0x70] sm:$0xff] (!%p1195_p3)  ;;  %1336 = vmatpush3.bf16.msra.mxu0 (!%p1195_p3), %v1335_v29 }
 0x1cb   : > { %v698_v39 = vmax.f32 %v696_v37, 0.0  ;;  %1337 = vmatprep.subr.bf16.mxu0 (!%p1195_p3), %v1830_v50  ;;  %v1362_v36 = vpack.c.bf16 (!%p1195_p3), %v799_v34, %v798_v33 }
 0x1cc   : > { %v697_v40 = vmax.f32 %v695_v38, 0.0 }
 0x1ce   : > { %v1314_v41 = vpack.c.bf16 %v698_v39, %v697_v40  ;;  %1339 = vmatpush3.bf16.msra.mxu0 (!%p1195_p3), %v1338_v35  ;;  %v965_v39 = vsub.s32 (!%p1195_p3), 0, %v2239_v17  ;;  %v973_v40 = vpop.permute.xlu0 (!%p1195_p3), %972 }
 0x1d0   : > { %1315 = vmatpush3.bf16.msra.mxu1 %v1314_v41  ;;  %v978_v41 = vrot.slane (!%p1195_p3), %v973_v40, %v965_v39 }
 0x1d1   : > { %1340 = vmatprep.subr.bf16.mxu1 (!%p1195_p3), %v1830_v50 }
 0x1d2   : > { %1534 = vrcp.f32 (!%p1195_p3), %v978_v41 }
 0x1d3   : > { %1241 = vmatmul.mubr.msk.f32.vlgmr.msra.gmra.mrb[4].mxu1 %vm702_vm4, %v701_v42  ;;  %v961_v42 = vpop.permute.xlu0 (!%p1195_p3), %960 }
 0x1d4   : > { %1310 = vmatprep.mubr.msk.f32.mxu1 (!%p1195_p3), %vm1831_vm5, %v1832_v58  ;;  %1342 = vmatpush3.bf16.msra.mxu1 (!%p1195_p3), %v1341_v55 }
 0x1d5   : > { %1343 = vmatprep.subr.bf16.mxu1 (!%p1195_p3), %v1830_v50 }
 0x1d8   : > { %1345 = vmatpush3.bf16.msra.mxu1 (!%p1195_p3), %v1344_v61 }
 0x1d9   : > { %1346 = vmatprep.subr.bf16.mxu1 (!%p1195_p3), %v1830_v50 }
 0x1dc   : > { %1348 = vmatpush3.bf16.msra.mxu1 (!%p1195_p3), %v1347_v3  ;;  %v1535_v51 = vpop.eup (!%p1195_p3), %1534 }
 0x1dd   : > { %1349 = vmatprep.subr.bf16.mxu1 (!%p1195_p3), %v1830_v50 }
 0x1e0   : > { %1351 = vmatpush3.bf16.msra.mxu1 (!%p1195_p3), %v1350_v10 }
 0x1e1   : > { %1352 = vmatprep.subr.bf16.mxu1 (!%p1195_p3), %v1830_v50 }
 0x1e4   : > { %1354 = vmatpush3.bf16.msra.mxu1 (!%p1195_p3), %v1353_v18 }
 0x1e5   : > { %1355 = vmatprep.subr.bf16.mxu1 (!%p1195_p3), %v1830_v50 }
 0x1e8   : > { %1357 = vmatpush3.bf16.msra.mxu1 (!%p1195_p3), %v1356_v24 }
 0x1e9   : > { %1358 = vmatprep.subr.bf16.mxu1 (!%p1195_p3), %v1830_v50 }
 0x1ec   : > { %1360 = vmatpush3.bf16.msra.mxu1 (!%p1195_p3), %v1359_v30 }
 0x1ed   : > { %1361 = vmatprep.subr.bf16.mxu1 (!%p1195_p3), %v1830_v50 }
 0x1f0   : > { %1363 = vmatpush3.bf16.msra.mxu1 (!%p1195_p3), %v1362_v36 }
 0x2a3   : > { %781 = sbr.rel (%p1195_p3) target bundleno = 908 (0x38c), region = 84 }
 0x2a6   : > { %v772_v44 = vpop.f32.mrb[4].mxu1 }
 0x2a7   : > { %v776_v45 = vadd.f32 %v772_v44, %v700_v43  ;;  %v1242_v46 = vpop.f32.mrb[5].mxu1  ;;  %v966_v43 = vrot.slane (!%p1195_p3), %v961_v42, %v965_v39  ;;  %v957_v44 = vld [vmem:[%s2400_s24] sm:$0x1] (!%p1195_p3) }
 0x2a9   : > { %777 = vst [vmem:[#allocation2] sm:$0x3] %v776_v45  ;;  %v967_v48 = vmul.f32 (!%p1195_p3), %v966_v43, %v957_v44 }
 0x2b0   : > { %v800_v37 = vld [vmem:[#allocation2 + $0x1] sm:$0x1]  ;;  %v783_v38 = vld [vmem:[#allocation2] sm:$0x1] }
 0x2b1   : > { %1276 = vmatmul.mubr.f32.vlgmr.msra.gmra.mrb[0].mxu0 %v800_v37  ;;  %1311 = vmatmul.mubr.f32.vlgmr.msra.gmra.mrb[0].mxu1 %v783_v38 }
 0x384   : > { %v883_v45 = vpop.f32.mrb[0].mxu0  ;;  %v953_v46 = vpop.f32.mrb[0].mxu1 }
 0x385   : > { %v1277_v47 = vpop.f32.mrb[1].mxu0  ;;  %v954_v49 = vadd.f32 %v953_v46, %v883_v45  ;;  %v1312_v50 = vpop.f32.mrb[1].mxu1 }
 0x387   : > { %v968_v52 = vadd.f32 %v967_v48, %v954_v49 }
 0x389   : > { %v980_v53 = vmul.f32 %v1535_v51, %v968_v52 }
 0x38b   : > { %981 = vst [vmem:[%s2232_s7] sm:$0x1] %v980_v53 }
 0x38c PF: > { %s2401_s27 = sld [smem:[#allocation21_spill]]  ;;  %s2402_s20 = sld [smem:[#allocation22_spill]] }
 0x38d   : > { %s2403_s9 = sld [smem:[#allocation33_spill]]  ;;  %s995_s4 = sshll.u32 %s2232_s7, 4  ;;  %s996_s4 = int_to_ptr.vmem [resolvable:$true] %s995_s4 }
 0x38e   : > { %s983_s28 = scalar_lea.sflag [#allocation6], %s485_s23  ;;  %s1680_s6 = scalar_lea.vmem %s996_s4, 16 }
 0x38f   : > { %p1681_p1 = scmp.ne.s32.totalorder %s996_s4, %s1680_s6  ;;  %s1834_s15 = smov [#allocation13]  }
 0x390   : > { %s1684_s26 = sshll.u32 %s1834_s15, 4  ;;  %s1685_s26 = int_to_ptr.vmem [resolvable:$false] %s1684_s26 }
 0x391   : > { %s1686_s21 = scalar_lea.vmem %s1685_s26, 32  ;;  %p1687_p0 = scmp.lt.s32.totalorder %s996_s4, %s1685_s26 }
 0x392   : > { %s1196_s0 = sshll.u32 %s2401_s27, 4  ;;  %p2404_p11 = scmp.ne.s32.totalorder %s2402_s20, 0 }
 0x393   : > { %s2278_s29 = scalar_lea.hbm %s2403_s9, %s1196_s0  ;;  %p1688_p2 = scmp.lt.s32.totalorder %s1686_s21, %s1680_s6 }
 0x394   : > { %p1682_p9 = pnand %p1681_p1, %p2404_p11 }
 0x395   : > { %p1689_p10 = por %p1688_p2, %p1687_p0 }
 0x396   : > { %p1683_p5 = pneg %p1682_p9 }
 0x398   : > { %p1690_p13 = pnand %p1689_p10, %p1683_p5 }
 0x39a   : > { %1693 = shalt.err (!%p1690_p13)
}
 0x39b   : > { %s1694_s23 = scalar_lea.hbm %s2278_s29, 16  ;;  %s1698_s16 = scalar_lea.hbm %s2403_s9, 32 }
 0x39c   : > { %p1695_p6 = scmp.ne.s32.totalorder %s2278_s29, %s1694_s23  ;;  %p1699_p4 = scmp.lt.u32.totalorder %s2278_s29, %s2403_s9 }
 0x39d   : > { %p1700_p7 = scmp.lt.u32.totalorder %s1698_s16, %s1694_s23  ;;  %p1702_p1 = scmp.lt.u32.totalorder %s1694_s23, %s2278_s29 }
 0x39e   : > { %p1696_p8 = pnand %p1695_p6, %p2404_p11 }
 0x39f   : > { %p1701_p3 = por %p1700_p7, %p1699_p4 }
 0x3a0   : > { %p1697_p12 = pneg %p1696_p8 }
 0x3a1   : > { %p1703_p9 = por %p1702_p1, %p1701_p3 }
 0x3a3   : > { %p1704_p5 = pnand %p1703_p9, %p1697_p12 }
 0x3a5   : > { %1707 = shalt.err (!%p1704_p5)
}
 0x3a6   : > { %1384 = dma.vmem_to_hbm [thread:$0]  (%p2404_p11), %s996_s4, 16, %s2278_s29, %s983_s28  }
 0x3a7 PF: > { %s2405_s24 = sld [smem:[#allocation19_spill]]  ;;  %s2406_s27 = sld [smem:[#allocation23_spill]] }
 0x3a8   : > { %p1414_p0 = scmp.ge.s32.totalorder %s1814_s19, 2 }
 0x3ad   : > { %s1007_s0 = sand.u32 1, %s2405_s24   ;;  %p2407_p2 = scmp.ne.s32.totalorder %s2406_s27, 0 }
 0x3ae   : > { %s1008_s30 = scalar_lea.sflag [#allocation6], %s1007_s0 }
 0x3af   : > { %p1404_p10 = pnand %p1414_p0, %p2407_p2 }
 0x3b1   : > { %1769 = dma.done.wait (!%p1404_p10), %s1008_s30, 16  }
 0x3b2   : > { %1771 = vsyncadd (!%p1404_p10), %s1008_s30, 4294967280  ;;  %s29_s19 = sadd.s32 1, %s1814_s19   ;;  %s2408_s20 = sld [smem:[#allocation24_spill]] }
 0x3b3   : > { %p26_p13 = scmp.ge.s32.totalorder %s29_s19, 6   ;;  %s2409_s30 = smov %s1778_s10 }
 0x3b4   : > { %s2410_s10 = smov %s1782_s11  ;;  %s2411_s11 = smov %s2091_s22 }
 0x3b5   : > { %s2412_s12 = smov %s1790_s13  ;;  %s2413_s13 = smov %s1794_s14 }
 0x3b6   : > { %s2414_s14 = smov %s2094_s8  ;;  %s2415_s15 = smov %s1806_s17 }
 0x3b7   : > { %s2416_s16 = smov %s1810_s18  ;;  %s2417_s17 = smov %s2420_s5 }
 0x3b8   : > { %s2418_s18 = smov %s2408_s20  ;;  %28 = sbr.rel (!%p26_p13) target bundleno = 22 (0x16), region = 141 }
 0x3bf   :  { %1012 = vsyncpa [#allocation5], 1 }
 0x3c0   :  { %1014 = vsyncpa [#allocation5 + $0x1], 1 }
 0x3c1   :  { %1015 = vsyncpa [#allocation8], 1 }
 0x3c2   :  { %1017 = vsyncpa [#allocation8 + $0x1], 1 }
 0x3c3   :  { %1018 = vsyncpa [#allocation11], 1 }
 0x3c4   :  { %1019 = vsyncpa [#allocation6], 1 }
 0x3c5   :  { %1021 = vsyncpa [#allocation6 + $0x1], 1 }

// kernel: tpu_custom_call.1
= control target key start
LH: loop header
LB: loop body
LE: loop exit
PB: predicated region body
PF: predicated region fallthrough
CT: control target
= control target key end

     0   :  { %s2337_s0 = inlined_call_operand.hbm [shape: bf16[2,32,32], index: 0, kind: input, shape index: {}]   ;;  %s2338_s1 = inlined_call_operand.hbm [shape: bf16[2,32,32], index: 1, kind: input, shape index: {}]   ;;  %s2339_s2 = inlined_call_operand.vmem [shape: f32[2,2,2,16], index: 2, kind: input, shape index: {}]   ;;  %s2340_s3 = inlined_call_operand.vmem [shape: f32[2,1,1], index: 3, kind: input, shape index: {}]   ;;  %s2341_s4 = inlined_call_operand.hbm [shape: bf16[2,32,256], index: 4, kind: input, shape index: {}]   ;;  %s2342_s5 = inlined_call_operand.vmem [shape: f32[1,128], index: 5, kind: input, shape index: {}]   ;;  %s2343_s6 = inlined_call_operand.hbm [shape: f32[128,128], index: 6, kind: input, shape index: {}]   ;;  %s2344_s7 = inlined_call_operand.hbm [shape: f32[128,128], index: 7, kind: input, shape index: {}]   ;;  %s2345_s8 = inlined_call_operand.vmem [shape: f32[1,128], index: 8, kind: input, shape index: {}]   ;;  %s2346_s9 = inlined_call_operand.hbm [shape: f32[2,1,128], index: 9, kind: output, shape index: {}]  }
   0x1   :  { %2359 = sst [smem:[#allocation25_spill]] %s2337_s0 }
   0x2   :  { %2360 = sst [smem:[#allocation26_spill]] %s2339_s2 }
   0x3   :  { %2361 = sst [smem:[#allocation27_spill]] %s2340_s3 }
   0x4   :  { %2362 = sst [smem:[#allocation28_spill]] %s2341_s4 }
   0x5   :  { %2363 = sst [smem:[#allocation29_spill]] %s2342_s5 }
   0x6   :  { %2364 = sst [smem:[#allocation30_spill]] %s2343_s6 }
   0x7   :  { %2365 = sst [smem:[#allocation31_spill]] %s2344_s7 }
   0x8   :  { %2366 = sst [smem:[#allocation32_spill]] %s2345_s8 }
   0x9   :  { %2367 = sst [smem:[#allocation33_spill]] %s2346_s9 }
   0xa   :  { %14 = vsyncpa [#allocation5], 0 }
   0xb   :  { %16 = vsyncpa [#allocation5 + $0x1], 0 }
   0xc   :  { %17 = vsyncpa [#allocation8], 0 }
   0xd   :  { %19 = vsyncpa [#allocation8 + $0x1], 0 }
   0xe   :  { %20 = vsyncpa [#allocation11], 0 }
   0xf   :  { %21 = vsyncpa [#allocation6], 0 }
  0x10   :  { %23 = vsyncpa [#allocation6 + $0x1], 0  ;;  %s1885_s30 = smov 0   ;;  %s1887_s10 = smov 0  }
  0x11   :  { %s1889_s11 = smov 0   ;;  %s1891_s12 = smov 0  }
  0x12   :  { %s1893_s13 = smov 0   ;;  %s1895_s14 = smov 0  }
  0x13   :  { %s1897_s15 = smov 0   ;;  %s1899_s16 = smov 0  }
  0x14   :  { %s1901_s17 = smov 0   ;;  %s1903_s18 = smov 0  }
  0x15   :  { %s1905_s19 = smov 0  }
  0x16 LB: > { %2368 = sst [smem:[#allocation19_spill]] %s1774_s30  ;;  %s1939_s20 = sadd.s32 4294967295, %s1814_s19   ;;  %s1814_s19 = sphi %s1905_s19, %s29_s19   ;;  %s1810_s18 = sphi %s1903_s18, %s2418_s18   ;;  %s1806_s17 = sphi %s1901_s17, %s2417_s17   ;;  %s1802_s16 = sphi %s1899_s16, %s2416_s16   ;;  %s1798_s15 = sphi %s1897_s15, %s2415_s15   ;;  %s1794_s14 = sphi %s1895_s14, %s2414_s14   ;;  %s1790_s13 = sphi %s1893_s13, %s2413_s13   ;;  %s1786_s12 = sphi %s1891_s12, %s2412_s12   ;;  %s1782_s11 = sphi %s1889_s11, %s2411_s11   ;;  %s1778_s10 = sphi %s1887_s10, %s2410_s10   ;;  %s1774_s30 = sphi %s1885_s30, %s2409_s30  }
  0x17   : > { %2369 = sst [smem:[#allocation20_spill]] %s1798_s15  ;;  %s1157_s21 = sadd.s32 4294967294, %s1814_s19  }
  0x18   : > { %2370 = sst [smem:[#allocation21_spill]] %s1802_s16  ;;  %p63_p0 = scmp.ne.s32.totalorder %s1790_s13, %s1786_s12 }
  0x19   : > { %p2352_p1 = scmp.eq.s32.totalorder %s1939_s20, 0  ;;  %p273_p2 = scmp.ne.s32.totalorder %s1782_s11, %s1778_s10 }
  0x1a   : > { %p274_p4 = scmp.eq.s32.totalorder %s1939_s20, 3  ;;  %p279_p5 = scmp.ne.s32.totalorder %s1778_s10, %s1774_s30 }
  0x1b   : > { %p1949_p3 = por %p2352_p1, %p63_p0  ;;  %p280_p6 = scmp.eq.s32.totalorder %s1157_s21, 3 }
  0x1c   : > { %p1956_p7 = por %p274_p4, %p273_p2  ;;  %p1158_p8 = scmp.ge.s32.totalorder %s1814_s19, 1 }
  0x1d   : > { %s2371_s23 = scalar_select %p1949_p3, 1, 0 }
  0x1e   : > { %s2372_s24 = scalar_select %p1956_p7, 1, 0 }
  0x1f   : > { %p1961_p9 = por %p280_p6, %p279_p5  ;;  %p287_p10 = scmp.lt.s32.totalorder %s1814_s19, 5 }
  0x20   : > { %2373 = sst [smem:[#allocation22_spill]] %s2372_s24  ;;  %s1816_s27 = smov [#allocation9]  }
  0x21   : > { %s2374_s25 = scalar_select %p1961_p9, 1, 0 }
  0x22   : > { %p1966_p11 = pnand %p1158_p8, %p287_p10  ;;  %s299_s28 = sshll.u32 %s1816_s27, 4  ;;  %s1970_s28 = int_to_ptr.vmem [resolvable:$true] %s299_s28 }
  0x23   : > { %2375 = sst [smem:[#allocation23_spill]] %s2374_s25  ;;  %s1817_s12 = smov [#allocation10]  }
  0x24   : > { %s2376_s26 = scalar_select %p1966_p11, 1, 0 }
  0x25   : > { %p1386_p12 = pneg %p1966_p11  ;;  %s315_s21 = sshll.u32 %s1817_s12, 4  ;;  %s1980_s21 = int_to_ptr.vmem [resolvable:$true] %s315_s21 }
  0x26   : > { %s1818_s22 = smov [#allocation12]   ;;  %s2378_s4 = sld [smem:[#allocation28_spill]] }
  0x27   : > { %p1976_p13 = pnand %p1386_p12, %p2352_p1  ;;  %s1982_s25 = sshll.u32 %s1818_s22, 4  ;;  %s329_s25 = int_to_ptr.vmem [resolvable:$true] %s1982_s25 }
  0x29   : > { %p1992_p2 = pneg %p1976_p13 }
  0x2c   : > { %s1536_s27 = scalar_lea.hbm %s2378_s4, 1024 }
  0x2d   : > { %p1537_p0 = scmp.ne.s32.totalorder %s2378_s4, %s1536_s27  ;;  %p1543_p6 = scmp.lt.u32.totalorder %s1536_s27, %s2378_s4 }
  0x2f   : > { %p1539_p4 = pnand %p1992_p2, %p1537_p0 }
  0x31   : > { %p1540_p5 = pneg %p1539_p4 }
  0x33   : > { %p1545_p8 = pnand %p1543_p6, %p1540_p5 }
  0x35   : > { %1548 = shalt.err (!%p1545_p8)
}
  0x36   : > { %s1549_s8 = scalar_lea.vmem %s1970_s28, 1024  ;;  %p1557_p9 = scmp.lt.s32.totalorder %s1970_s28, %s1970_s28 }
  0x37   : > { %p1550_p10 = scmp.ne.s32.totalorder %s1970_s28, %s1549_s8  ;;  %p1558_p7 = scmp.lt.s32.totalorder %s1549_s8, %s1549_s8 }
  0x39   : > { %p1552_p12 = pnand %p1550_p10, %p1992_p2  ;;  %p1559_p0 = por %p1558_p7, %p1557_p9 }
  0x3b   : > { %p1553_p1 = pneg %p1552_p12 }
  0x3d   : > { %p1560_p4 = pnand %p1559_p0, %p1553_p1 }
  0x3f   : > { %1563 = shalt.err (!%p1560_p4)
}
  0x40   : > { %s1819_s9 = smov 128   ;;  %s1820_s30 = smov 8  }
  0x41   : > { %1389 = dma.hbm_to_vmem [thread:$0]  (!%p1976_p13), %s2378_s4, 1024, %s1970_s28, [#allocation8], %s1819_s9, %s1819_s9, %s1820_s30  }
  0x42   : > { %s2380_s6 = sld [smem:[#allocation30_spill]] }
  0x48   : > { %s1564_s8 = scalar_lea.hbm %s2380_s6, 2048 }
  0x49   : > { %p1565_p1 = scmp.ne.s32.totalorder %s2380_s6, %s1564_s8  ;;  %p1571_p5 = scmp.lt.u32.totalorder %s1564_s8, %s2380_s6 }
  0x4b   : > { %p1567_p7 = pnand %p1565_p1, %p1992_p2 }
  0x4d   : > { %p1568_p9 = pneg %p1567_p7 }
  0x4f   : > { %p1573_p6 = pnand %p1571_p5, %p1568_p9 }
  0x51   : > { %1576 = shalt.err (!%p1573_p6)
}
  0x52   : > { %s1577_s28 = scalar_lea.vmem %s1980_s21, 2048  ;;  %p1585_p0 = scmp.lt.s32.totalorder %s1980_s21, %s1980_s21 }
  0x53   : > { %p1578_p8 = scmp.ne.s32.totalorder %s1980_s21, %s1577_s28  ;;  %p1586_p4 = scmp.lt.s32.totalorder %s1577_s28, %s1577_s28 }
  0x55   : > { %p1580_p10 = pnand %p1578_p8, %p1992_p2  ;;  %p1587_p1 = por %p1586_p4, %p1585_p0 }
  0x57   : > { %p1581_p12 = pneg %p1580_p10 }
  0x59   : > { %p1588_p7 = pnand %p1587_p1, %p1581_p12 }
  0x5b   : > { %1591 = shalt.err (!%p1588_p7)
}
  0x5c   : > { %1392 = dma.hbm_to_vmem [thread:$0]  (!%p1976_p13), %s2380_s6, 2048, %s1980_s21, [#allocation11], %s1819_s9, %s1819_s9, %s1820_s30  }
  0x5d   : > { %s2381_s7 = sld [smem:[#allocation31_spill]] }
  0x63   : > { %s1592_s24 = scalar_lea.hbm %s2381_s7, 2048 }
  0x64   : > { %p1593_p9 = scmp.ne.s32.totalorder %s2381_s7, %s1592_s24  ;;  %p1599_p8 = scmp.lt.u32.totalorder %s1592_s24, %s2381_s7 }
  0x66   : > { %p1595_p5 = pnand %p1593_p9, %p1992_p2 }
  0x68   : > { %p1596_p6 = pneg %p1595_p5 }
  0x6a   : > { %p1601_p10 = pnand %p1599_p8, %p1596_p6 }
  0x6c   : > { %1604 = shalt.err (!%p1601_p10)
}
  0x6d   : > { %s1605_s28 = scalar_lea.vmem %s329_s25, 2048  ;;  %p1613_p1 = scmp.lt.s32.totalorder %s329_s25, %s329_s25 }
  0x6e   : > { %p1606_p12 = scmp.ne.s32.totalorder %s329_s25, %s1605_s28  ;;  %p1614_p7 = scmp.lt.s32.totalorder %s1605_s28, %s1605_s28 }
  0x70   : > { %p1608_p0 = pnand %p1606_p12, %p1992_p2  ;;  %p1615_p3 = por %p1614_p7, %p1613_p1 }
  0x72   : > { %p1609_p4 = pneg %p1608_p0 }
  0x74   : > { %p1616_p11 = pnand %p1615_p3, %p1609_p4 }
  0x76   : > { %1619 = shalt.err (!%p1616_p11)
}
  0x77   : > { %1395 = dma.hbm_to_vmem [thread:$0]  (!%p1976_p13), %s2381_s7, 2048, %s329_s25, [#allocation11], %s1819_s9, %s1819_s9, %s1820_s30  }
  0x78   : > { %s38_s5 = sadd.s32 1, %s1806_s17  ;;  %s41_s29 = sadd.s32 1, %s1810_s18 }
  0x79   : > { %p39_p3 = scmp.ge.s32.totalorder %s38_s5, 2  ;;  %s50_s3 = sadd.s32 1, %s1794_s14 }
  0x7a   : > { %p57_p11 = scmp.ne.s32.totalorder %s1794_s14, %s1790_s13  ;;  %p58_p2 = scmp.eq.s32.totalorder %s1814_s19, 0 }
  0x7b   : > { %s2420_s5 = smov (%p39_p3, %s38_s5), 0  ;;  %s2422_s29 = smov (!%p39_p3, %s41_s29), %s1810_s18 }
  0x7c   : > { %s46_s15 = ssub.s32 %s1806_s17, %s2420_s5  ;;  %p43_p9 = scmp.ge.s32.totalorder %s2422_s29, 2 }
  0x7d   : > { %p1410_p5 = scmp.lt.s32.totalorder %s1814_s19, 4  ;;  %p2076_p13 = por %p58_p2, %p57_p11 }
  0x7e   : > { %s345_s9 = sand.u32 1, %s1794_s14   ;;  %s2424_s29 = smov (%p43_p9, %s2422_s29), 0 }
  0x7f   : > { %2383 = sst [smem:[#allocation24_spill]] %s2424_s29  ;;  %s2083_s30 = sshll.u32 %s345_s9, 3 }
  0x80   : > { %s45_s16 = ssub.s32 %s1810_s18, %s2424_s29  ;;  %s1164_s27 = sshll.u32 %s1806_s17, 1 }
  0x81   : > { %s47_s24 = sor.u32 %s46_s15, %s45_s16  ;;  %p261_p6 = scmp.eq.s32.totalorder %s45_s16, 0 }
  0x82   : > { %p48_p8 = scmp.eq.s32.totalorder %s47_s24, 0  ;;  %s2384_s12 = sadd.s32 1, %s1782_s11 }
  0x83   : > { %s2091_s22 = scalar_select %p261_p6, %s1782_s11, %s2384_s12  }
  0x84   : > { %s2094_s8 = scalar_select %p48_p8, %s1794_s14, %s50_s3  }
  0x85   : > { %s1165_s28 = sshll.u32 %s1810_s18, 2  ;;  %s349_s21 = scalar_lea.vmem [#allocation4], %s2083_s30 }
  0x86   : > { %s358_s2 = sshll.u32 %s349_s21, 4  ;;  %s2098_s4 = sadd.s32 %s1165_s28, %s1164_s27  ;;  %s2100_s2 = int_to_ptr.vmem [resolvable:$true] %s358_s2 }
  0x87   : > { %s1166_s6 = sshll.u32 %s2098_s4, 6  ;;  %p2107_p10 = pnand %p1410_p5, %p2076_p13 }
  0x88   : > { %s2386_s0 = sld [smem:[#allocation25_spill]]  ;;  %s2118_s27 = scalar_lea.sflag [#allocation5], %s345_s9 }
  0x89   : > { %p1622_p0 = pneg %p2107_p10 }
  0x8e   : > { %s2116_s24 = scalar_lea.hbm %s2386_s0, %s1166_s6  ;;  %s1625_s21 = scalar_lea.hbm %s2386_s0, 512 }
  0x8f   : > { %s1620_s25 = scalar_lea.hbm %s2116_s24, 128  ;;  %p1626_p7 = scmp.lt.u32.totalorder %s2116_s24, %s2386_s0 }
  0x90   : > { %p1621_p12 = scmp.ne.s32.totalorder %s2116_s24, %s1620_s25  ;;  %p1627_p3 = scmp.lt.u32.totalorder %s1625_s21, %s1620_s25 }
  0x91   : > { %p1629_p2 = scmp.lt.u32.totalorder %s1620_s25, %s2116_s24 }
  0x92   : > { %p1623_p4 = pnand %p1622_p0, %p1621_p12  ;;  %p1628_p11 = por %p1627_p3, %p1626_p7 }
  0x94   : > { %p1624_p1 = pneg %p1623_p4  ;;  %p1630_p9 = por %p1629_p2, %p1628_p11 }
  0x96   : > { %p1631_p5 = pnand %p1630_p9, %p1624_p1 }
  0x98   : > { %1634 = shalt.err (!%p1631_p5)
}
  0x99   : > { %s1635_s9 = scalar_lea.vmem %s2100_s2, 128  ;;  %s1821_s12 = smov [#allocation4]  }
  0x9a   : > { %p1636_p13 = scmp.ne.s32.totalorder %s2100_s2, %s1635_s9  ;;  %s1640_s28 = sshll.u32 %s1821_s12, 4  ;;  %s1641_s28 = int_to_ptr.vmem [resolvable:$false] %s1640_s28 }
  0x9b   : > { %s1642_s16 = scalar_lea.vmem %s1641_s28, 256  ;;  %p1643_p12 = scmp.lt.s32.totalorder %s2100_s2, %s1641_s28 }
  0x9c   : > { %p1638_p6 = pnand %p1636_p13, %p1622_p0  ;;  %p1644_p4 = scmp.lt.s32.totalorder %s1642_s16, %s1635_s9 }
  0x9e   : > { %p1639_p8 = pneg %p1638_p6  ;;  %p1645_p7 = por %p1644_p4, %p1643_p12 }
  0xa0   : > { %p1646_p3 = pnand %p1645_p7, %p1639_p8 }
  0xa2   : > { %1649 = shalt.err (!%p1646_p3)
}
  0xa3   : > { %s1822_s25 = smov 64   ;;  %s1823_s21 = smov 4  }
  0xa4   : > { %1399 = dma.hbm_to_vmem [thread:$0]  (!%p2107_p10), %s2116_s24, 128, %s2100_s2, %s2118_s27, %s1822_s25, %s1822_s25, %s1823_s21  }
  0xa5   : > { %s2154_s12 = scalar_lea.hbm %s2338_s1, %s1166_s6  ;;  %s372_s28 = scalar_lea.vmem [#allocation7], %s2083_s30 }
  0xa6   : > { %s381_s16 = sshll.u32 %s372_s28, 4  ;;  %s368_s0 = sand.u32 1, %s1814_s19   ;;  %s2158_s16 = int_to_ptr.vmem [resolvable:$true] %s381_s16 }
  0xa7   : > { %s2160_s7 = scalar_lea.sflag [#allocation8], %s368_s0  ;;  %s1650_s29 = scalar_lea.hbm %s2154_s12, 128 }
  0xa8   : > { %p1651_p1 = scmp.ne.s32.totalorder %s2154_s12, %s1650_s29  ;;  %s1655_s2 = scalar_lea.hbm %s2338_s1, 512 }
  0xa9   : > { %p1656_p9 = scmp.lt.u32.totalorder %s2154_s12, %s2338_s1  ;;  %p1657_p5 = scmp.lt.u32.totalorder %s1655_s2, %s1650_s29 }
  0xaa   : > { %p1653_p11 = pnand %p1651_p1, %p1622_p0  ;;  %p1659_p6 = scmp.lt.u32.totalorder %s1650_s29, %s2154_s12 }
  0xab   : > { %p1658_p13 = por %p1657_p5, %p1656_p9 }
  0xac   : > { %p1654_p2 = pneg %p1653_p11 }
  0xad   : > { %p1660_p8 = por %p1659_p6, %p1658_p13 }
  0xaf   : > { %p1661_p12 = pnand %p1660_p8, %p1654_p2 }
  0xb1   : > { %1664 = shalt.err (!%p1661_p12)
}
  0xb2   : > { %s1665_s0 = scalar_lea.vmem %s2158_s16, 128  ;;  %s1824_s30 = smov [#allocation7]  }
  0xb3   : > { %p1666_p4 = scmp.ne.s32.totalorder %s2158_s16, %s1665_s0  ;;  %s1670_s3 = sshll.u32 %s1824_s30, 4  ;;  %s1671_s3 = int_to_ptr.vmem [resolvable:$false] %s1670_s3 }
  0xb4   : > { %s1672_s9 = scalar_lea.vmem %s1671_s3, 256  ;;  %p1673_p1 = scmp.lt.s32.totalorder %s2158_s16, %s1671_s3 }
  0xb5   : > { %p1668_p7 = pnand %p1666_p4, %p1622_p0  ;;  %p1674_p11 = scmp.lt.s32.totalorder %s1672_s9, %s1665_s0 }
  0xb7   : > { %p1669_p3 = pneg %p1668_p7  ;;  %p1675_p9 = por %p1674_p11, %p1673_p1 }
  0xb9   : > { %p1676_p5 = pnand %p1675_p9, %p1669_p3 }
  0xbb   : > { %1679 = shalt.err (!%p1676_p5)
}
  0xbc   : > { %1402 = dma.hbm_to_vmem [thread:$0]  (!%p2107_p10), %s2154_s12, 128, %s2158_s16, %s2160_s7, %s1822_s25, %s1822_s25, %s1823_s21  }
  0xbd   : > { %p2387_p0 = scmp.ne.s32.totalorder %s2376_s26, 0 }
  0xbe   : > { %s412_s29 = sand.u32 (!%p2387_p0), 1, %s1790_s13   ;;  %p2388_p2 = scmp.ne.s32.totalorder (!%p2387_p0), %s2371_s23, 0 }
  0xbf   : > { %410 = sbr.rel (%p2387_p0) target bundleno = 935 (0x3a7), region = 56  ;;  %s2192_s28 = sshll.u32 (!%p2387_p0), %s412_s29, 3 }
  0xc0   : > { %s413_s4 = scalar_lea.sflag (!%p2387_p0), [#allocation5], %s412_s29  ;;  %s416_s6 = scalar_lea.vmem (!%p2387_p0), [#allocation4], %s2192_s28 }
  0xc6   : > { %1753 = dma.done.wait (%p2388_p2), %s413_s4, 128  }
  0xc7   : > { %1755 = vsyncadd (%p2388_p2), %s413_s4, 4294967168  ;;  %s421_s7 = sand.u32 1, %s1939_s20   ;;  %s425_s26 = scalar_lea.vmem [#allocation7], %s2192_s28 }
  0xc8   : > { %s422_s15 = scalar_lea.sflag [#allocation8], %s421_s7 }
  0xc9   : > { %1757 = dma.done.wait (%p2388_p2), %s422_s15, 128  }
  0xca   : > { %1759 = vsyncadd (%p2388_p2), %s422_s15, 4294967168  ;;  %p2389_p10 = scmp.eq.s32.totalorder %s1939_s20, 0 }
  0xcc   : > { %1761 = dma.done.wait (%p2389_p10), [#allocation8], 1024   ;;  %p2390_p13 = pmov %p2389_p10 }
  0xcd   : > { %p2391_p6 = pmov %p2389_p10 }
  0xce   : > { %1763 = vsyncadd (%p2390_p13), [#allocation8], 4294966272 }
  0xcf   : > { %1765 = dma.done.wait (%p2391_p6), [#allocation11], 4096   ;;  %p2392_p8 = pmov %p2391_p6 }
  0xd0   : > { %s2393_s25 = sld [smem:[#allocation21_spill]]  ;;  %s2394_s21 = sld [smem:[#allocation20_spill]] }
  0xd1   : > { %1767 = vsyncadd (%p2392_p8), [#allocation11], 4294963200  ;;  %s485_s23 = sand.u32 1, %s1778_s10   ;;  %s2395_s27 = sld [smem:[#allocation27_spill]] }
  0xd2   : > { %s2396_s29 = sld [smem:[#allocation26_spill]]  ;;  %s2232_s7 = scalar_lea.vmem [#allocation13], %s485_s23 }
  0xd6   : > { %p489_p12 = scmp.lt.s32.totalorder %s2393_s25, 1  ;;  %p491_p4 = scmp.lt.s32.totalorder %s2394_s21, 1 }
  0xd7   : > { %p1179_p7 = scmp.ne.s32.totalorder %s2394_s21, 0 }
  0xd8   : > { %s2426_s25 = smov (!%p489_p12, %s2393_s25), 1  ;;  %v1825_v0 = vmov (!%p1179_p7), 0.0  }
  0xd9   : > { %s492_s12 = scalar_select %p491_p4, %s2394_s21, 1 }
  0xda   : > { %s1177_s16 = sshll.u32 %s2426_s25, 1  ;;  %s499_s20 = scalar_lea.vmem %s2395_s27, %s2426_s25  ;;  %505 = vst [vmem:[#allocation2] sm:$0x3] (!%p1179_p7), %v1825_v0  ;;  %506 = vst [vmem:[#allocation3] sm:$0x1] (!%p1179_p7), %v1825_v0 }
  0xdb   : > { %s494_s0 = sadd.s32 %s1177_s16, %s492_s12  ;;  %504 = sbr.rel (%p1179_p7) target bundleno = 226 (0xe2), region = 80 }
  0xdc   : > { %s1178_s30 = sshll.u32 %s494_s0, 1 }
  0xdd   : > { %s2228_s4 = scalar_lea.vmem %s2396_s29, %s1178_s30 }
  0xe2 PF: > { %v1519_v1 = vld [vmem:[#allocation9 + $0x24] ss:$8 sps:$4 sm:$0xff]   ;;  %v1826_v3 = vmov 0   ;;  %v1523_v4 = vld [vmem:[#allocation9 + $0x20] ss:$8 sps:$4 sm:$0xff]   ;;  %v1531_v10 = vld [vmem:[%s425_s26] sm:$0xff]   ;;  %v663_v14 = vlaneseq }
  0xe3   : > { %v1521_v2 = vld [vmem:[#allocation9 + $0x4] ss:$8 sps:$4 sm:$0xff]   ;;  %581 = vmatprep.mubr.bf16.mxu1 %v1826_v3  ;;  %652 = vmatprep.mubr.bf16.mxu0 %v1826_v3  ;;  %v1524_v5 = vld [vmem:[#allocation9] ss:$8 sps:$4 sm:$0xff]   ;;  %v1525_v6 = vld [vmem:[#allocation9 + $0x34] ss:$8 sps:$4 sm:$0xff]  }
  0xe4   : > { %549 = vmatprep.subr.bf16.mxu1 %v1519_v1  ;;  %620 = vmatprep.subr.bf16.mxu0 %v1521_v2  ;;  %v1527_v7 = vld [vmem:[#allocation9 + $0x14] ss:$8 sps:$4 sm:$0xff]   ;;  %v1529_v8 = vld [vmem:[#allocation9 + $0x30] ss:$8 sps:$4 sm:$0xff]   ;;  %v1532_v11 = vld [vmem:[%s416_s6] sm:$0xff]   ;;  %vm545_vm0 = vcmask 261120  }
  0xe5   : > { %550 = vmatpush1.bf16.msra.mxu1 %v1523_v4  ;;  %621 = vmatpush1.bf16.msra.mxu0 %v1524_v5  ;;  %v1530_v9 = vld [vmem:[#allocation9 + $0x10] ss:$8 sps:$4 sm:$0xff]   ;;  %v1827_v12 = vmov 0.0|0.0   ;;  %vm1828_vm1 = vmmov 0   ;;  %v1829_v13 = vmov 0.0   ;;  %v2239_v17 = vshrl.u32 %v663_v14, 7 }
  0xe6   : > { %551 = vmatprep.subr.bf16.mxu1 %v1525_v6  ;;  %622 = vmatprep.subr.bf16.mxu0 %v1527_v7  ;;  %v1192_v24 = vld [vmem:[#allocation3] ss:$0 sm:$0xff]  ;;  %s2397_s15 = sld [smem:[#allocation29_spill]]  ;;  %v701_v42 = vld [vmem:[%s2228_s4] sm:$0x3]  ;;  %vm702_vm4 = vcmask 130048  }
  0xe7   : > { %vm671_vm2 = vcmp.lt.s32.totalorder %v2239_v17, 1  ;;  %vm666_vm3 = vcmp.eq.s32.totalorder %v2239_v17, 0  ;;  %v700_v43 = vld [vmem:[#allocation2] sm:$0x3]  ;;  %s2398_s26 = sld [smem:[#allocation20_spill]] }
  0xe9   : > { %552 = vmatpush1.bf16.msra.mxu1 %v1529_v8  ;;  %623 = vmatpush1.bf16.msra.mxu0 %v1530_v9 }
  0xea   : > { %1313 = vmatprep.subr.bf16.mxu1 %v1827_v12 }
  0xec   : > { %1185 = vmatmul.mubr.msk.bf16.vlgmr.msra.gmra.mrb[0].mxu1 %vm545_vm0, %v1531_v10  ;;  %1191 = vmatmul.mubr.msk.bf16.vlgmr.msra.gmra.mrb[0].mxu0 %vm545_vm0, %v1532_v11  ;;  %v1193_v33 = vld [vmem:[%s2397_s15] ss:$0 sm:$0xff] }
  0xed   : > { %1240 = vmatprep.mubr.msk.f32.mxu1 %vm1828_vm1, %v1829_v13  ;;  %p1195_p3 = scmp.ne.s32.totalorder %s2398_s26, 1 }
  0xee   : > { %v801_v47 = vld [vmem:[#allocation12] sm:$0xff] (!%p1195_p3)  ;;  %v802_v48 = vld [vmem:[#allocation12 + $0x8] sm:$0xff] (!%p1195_p3)  ;;  %v1830_v50 = vmov (!%p1195_p3), 0.0|0.0   ;;  %v803_v53 = vld [vmem:[#allocation12 + $0x10] sm:$0xff] (!%p1195_p3)  ;;  %vm1831_vm5 = vmmov (!%p1195_p3), 0   ;;  %v1832_v58 = vmov (!%p1195_p3), 0.0  }
  0xef   : > { %v784_v49 = vld [vmem:[#allocation10] sm:$0xff] (!%p1195_p3)  ;;  %1316 = vmatprep.subr.bf16.mxu0 (!%p1195_p3), %v1830_v50  ;;  %v1317_v51 = vpack.c.bf16 (!%p1195_p3), %v802_v48, %v801_v47  ;;  %v785_v52 = vld [vmem:[#allocation10 + $0x8] sm:$0xff] (!%p1195_p3)  ;;  %v804_v54 = vld [vmem:[#allocation12 + $0x18] sm:$0xff] (!%p1195_p3)  ;;  %1275 = vmatprep.mubr.msk.f32.mxu0 (!%p1195_p3), %vm1831_vm5, %v1832_v58  ;;  %v1833_v60 = vmov (!%p1195_p3), 0   ;;  %s2400_s24 = sld [smem:[#allocation32_spill]] (!%p1195_p3) }
  0xf0   : > { %v1341_v55 = vpack.c.bf16 (!%p1195_p3), %v785_v52, %v784_v49  ;;  %v786_v56 = vld [vmem:[#allocation10 + $0x10] sm:$0xff] (!%p1195_p3)  ;;  %v787_v57 = vld [vmem:[#allocation10 + $0x18] sm:$0xff] (!%p1195_p3)  ;;  %v1320_v59 = vpack.c.bf16 (!%p1195_p3), %v804_v54, %v803_v53  ;;  %1533 = vset.pattern.permute.xlu0 (!%p1195_p3), %v1833_v60  ;;  %v805_v62 = vld [vmem:[#allocation12 + $0x20] sm:$0xff] (!%p1195_p3) }
  0xf1   : > { %1318 = vmatpush3.bf16.msra.mxu0 (!%p1195_p3), %v1317_v51  ;;  %v1344_v61 = vpack.c.bf16 (!%p1195_p3), %v787_v57, %v786_v56  ;;  %v806_v63 = vld [vmem:[#allocation12 + $0x28] sm:$0xff] (!%p1195_p3)  ;;  %v788_v0 = vld [vmem:[#allocation10 + $0x20] sm:$0xff] (!%p1195_p3)  ;;  %v807_v4 = vld [vmem:[#allocation12 + $0x30] sm:$0xff] (!%p1195_p3) }
  0xf2   : > { %1319 = vmatprep.subr.bf16.mxu0 (!%p1195_p3), %v1830_v50  ;;  %v789_v1 = vld [vmem:[#allocation10 + $0x28] sm:$0xff] (!%p1195_p3)  ;;  %v1323_v2 = vpack.c.bf16 (!%p1195_p3), %v806_v63, %v805_v62  ;;  %v808_v5 = vld [vmem:[#allocation12 + $0x38] sm:$0xff] (!%p1195_p3)  ;;  %v790_v6 = vld [vmem:[#allocation10 + $0x30] sm:$0xff] (!%p1195_p3) }
  0xf3   : > { %v1347_v3 = vpack.c.bf16 (!%p1195_p3), %v789_v1, %v788_v0  ;;  %v791_v7 = vld [vmem:[#allocation10 + $0x38] sm:$0xff] (!%p1195_p3)  ;;  %v1326_v8 = vpack.c.bf16 (!%p1195_p3), %v808_v5, %v807_v4  ;;  %v809_v11 = vld [vmem:[#allocation12 + $0x40] sm:$0xff] (!%p1195_p3)  ;;  %v810_v12 = vld [vmem:[#allocation12 + $0x48] sm:$0xff] (!%p1195_p3) }
  0xf4   : > { %v782_v9 = vld [vmem:[%s499_s20] sm:$0x1] (!%p1195_p3)  ;;  %v1350_v10 = vpack.c.bf16 (!%p1195_p3), %v791_v7, %v790_v6  ;;  %v792_v14 = vld [vmem:[#allocation10 + $0x40] sm:$0xff] (!%p1195_p3) }
  0xf5   : > { %1321 = vmatpush3.bf16.msra.mxu0 (!%p1195_p3), %v1320_v59  ;;  %v969_v13 = vmax.f32 (!%p1195_p3), %v782_v9, 1e-09 }
  0xf6   : > { %1322 = vmatprep.subr.bf16.mxu0 (!%p1195_p3), %v1830_v50 }
  0xf7   : > { %972 = vperm.xlu0 (!%p1195_p3), %1533, %v969_v13  }
  0xf9   : > { %1324 = vmatpush3.bf16.msra.mxu0 (!%p1195_p3), %v1323_v2 }
  0xfa   : > { %1325 = vmatprep.subr.bf16.mxu0 (!%p1195_p3), %v1830_v50 }
  0xfb   : > { %960 = vperm.xlu0 (!%p1195_p3), %1533, %v782_v9  }
  0xfd   : > { %1327 = vmatpush3.bf16.msra.mxu0 (!%p1195_p3), %v1326_v8 }
  0xfe   : > { %1328 = vmatprep.subr.bf16.mxu0 (!%p1195_p3), %v1830_v50 }
 0x1bf   : > { %v583_v15 = vpop.f32.mrb[0].mxu1  ;;  %v654_v16 = vpop.f32.mrb[0].mxu0 }
 0x1c0   : > { %v655_v18 = vadd.f32 %v654_v16, %v583_v15  ;;  %v585_v19 = vpop.f32.mrb[1].mxu1  ;;  %v656_v20 = vpop.f32.mrb[1].mxu0  ;;  %v793_v15 = vld [vmem:[#allocation10 + $0x48] sm:$0xff] (!%p1195_p3)  ;;  %v1329_v16 = vpack.c.bf16 (!%p1195_p3), %v810_v12, %v809_v11 }
 0x1c1   : > { %v657_v21 = vadd.f32 %v656_v20, %v585_v19  ;;  %v587_v22 = vpop.f32.mrb[2].mxu1  ;;  %v658_v23 = vpop.f32.mrb[2].mxu0  ;;  %v811_v19 = vld [vmem:[#allocation12 + $0x50] sm:$0xff] (!%p1195_p3)  ;;  %v812_v20 = vld [vmem:[#allocation12 + $0x58] sm:$0xff] (!%p1195_p3) }
 0x1c2   : > { %v659_v25 = vadd.f32 %v658_v23, %v587_v22  ;;  %v589_v26 = vpop.f32.mrb[3].mxu1  ;;  %v660_v27 = vpop.f32.mrb[3].mxu0  ;;  %v669_v29 = vrot.slane %v655_v18, 7  ;;  %v1353_v18 = vpack.c.bf16 (!%p1195_p3), %v793_v15, %v792_v14  ;;  %v795_v22 = vld [vmem:[#allocation10 + $0x58] sm:$0xff] (!%p1195_p3)  ;;  %1330 = vmatpush3.bf16.msra.mxu0 (!%p1195_p3), %v1329_v16  ;;  %v1332_v23 = vpack.c.bf16 (!%p1195_p3), %v812_v20, %v811_v19 }
 0x1c3   : > { %v661_v28 = vadd.f32 %v660_v27, %v589_v26  ;;  %1331 = vmatprep.subr.bf16.mxu0 (!%p1195_p3), %v1830_v50  ;;  %v814_v26 = vld [vmem:[#allocation12 + $0x68] sm:$0xff] (!%p1195_p3)  ;;  %v796_v27 = vld [vmem:[#allocation10 + $0x60] sm:$0xff] (!%p1195_p3) }
 0x1c4   : > { %v670_v30 = vrot.slane %v659_v25, 7  ;;  %699 = vst [vmem:[#allocation3 - $0x7] sm:$0x80] %v659_v25  ;;  %v813_v25 = vld [vmem:[#allocation12 + $0x60] sm:$0xff] (!%p1195_p3) }
 0x1c6   : > { %v673_v31 = vsel %vm671_vm2, %v670_v30, %v669_v29  ;;  %v672_v32 = vsel %vm671_vm2, %v669_v29, %v670_v30  ;;  %1333 = vmatpush3.bf16.msra.mxu0 (!%p1195_p3), %v1332_v23  ;;  %v1335_v29 = vpack.c.bf16 (!%p1195_p3), %v814_v26, %v813_v25 }
 0x1c7   : > { %v684_v34 = vsel %vm666_vm3, %v1192_v24, %v673_v31  ;;  %v687_v35 = vadd.f32 %v672_v32, %v661_v28  ;;  %v797_v28 = vld [vmem:[#allocation10 + $0x68] sm:$0xff] (!%p1195_p3)  ;;  %1334 = vmatprep.subr.bf16.mxu0 (!%p1195_p3), %v1830_v50  ;;  %v815_v31 = vld [vmem:[#allocation12 + $0x70] sm:$0xff] (!%p1195_p3)  ;;  %v816_v32 = vld [vmem:[#allocation12 + $0x78] sm:$0xff] (!%p1195_p3) }
 0x1c8   : > { %v686_v36 = vadd.f32 %v684_v34, %v657_v21  ;;  %v794_v21 = vld [vmem:[#allocation10 + $0x50] sm:$0xff] (!%p1195_p3)  ;;  %v1359_v30 = vpack.c.bf16 (!%p1195_p3), %v797_v28, %v796_v27  ;;  %v799_v34 = vld [vmem:[#allocation10 + $0x78] sm:$0xff] (!%p1195_p3) }
 0x1c9   : > { %v696_v37 = vadd.f32 %v1193_v33, %v687_v35  ;;  %v1356_v24 = vpack.c.bf16 (!%p1195_p3), %v795_v22, %v794_v21  ;;  %v1338_v35 = vpack.c.bf16 (!%p1195_p3), %v816_v32, %v815_v31 }
 0x1ca   : > { %v695_v38 = vadd.f32 %v1193_v33, %v686_v36  ;;  %v798_v33 = vld [vmem:[#allocation10 + $0x70] sm:$0xff] (!%p1195_p3)  ;;  %1336 = vmatpush3.bf16.msra.mxu0 (!%p1195_p3), %v1335_v29 }
 0x1cb   : > { %v698_v39 = vmax.f32 %v696_v37, 0.0  ;;  %1337 = vmatprep.subr.bf16.mxu0 (!%p1195_p3), %v1830_v50  ;;  %v1362_v36 = vpack.c.bf16 (!%p1195_p3), %v799_v34, %v798_v33 }
 0x1cc   : > { %v697_v40 = vmax.f32 %v695_v38, 0.0 }
 0x1ce   : > { %v1314_v41 = vpack.c.bf16 %v698_v39, %v697_v40  ;;  %1339 = vmatpush3.bf16.msra.mxu0 (!%p1195_p3), %v1338_v35  ;;  %v965_v39 = vsub.s32 (!%p1195_p3), 0, %v2239_v17  ;;  %v973_v40 = vpop.permute.xlu0 (!%p1195_p3), %972 }
 0x1d0   : > { %1315 = vmatpush3.bf16.msra.mxu1 %v1314_v41  ;;  %v978_v41 = vrot.slane (!%p1195_p3), %v973_v40, %v965_v39 }
 0x1d1   : > { %1340 = vmatprep.subr.bf16.mxu1 (!%p1195_p3), %v1830_v50 }
 0x1d2   : > { %1534 = vrcp.f32 (!%p1195_p3), %v978_v41 }
 0x1d3   : > { %1241 = vmatmul.mubr.msk.f32.vlgmr.msra.gmra.mrb[4].mxu1 %vm702_vm4, %v701_v42  ;;  %v961_v42 = vpop.permute.xlu0 (!%p1195_p3), %960 }
 0x1d4   : > { %1310 = vmatprep.mubr.msk.f32.mxu1 (!%p1195_p3), %vm1831_vm5, %v1832_v58  ;;  %1342 = vmatpush3.bf16.msra.mxu1 (!%p1195_p3), %v1341_v55 }
 0x1d5   : > { %1343 = vmatprep.subr.bf16.mxu1 (!%p1195_p3), %v1830_v50 }
 0x1d8   : > { %1345 = vmatpush3.bf16.msra.mxu1 (!%p1195_p3), %v1344_v61 }
 0x1d9   : > { %1346 = vmatprep.subr.bf16.mxu1 (!%p1195_p3), %v1830_v50 }
 0x1dc   : > { %1348 = vmatpush3.bf16.msra.mxu1 (!%p1195_p3), %v1347_v3  ;;  %v1535_v51 = vpop.eup (!%p1195_p3), %1534 }
 0x1dd   : > { %1349 = vmatprep.subr.bf16.mxu1 (!%p1195_p3), %v1830_v50 }
 0x1e0   : > { %1351 = vmatpush3.bf16.msra.mxu1 (!%p1195_p3), %v1350_v10 }
 0x1e1   : > { %1352 = vmatprep.subr.bf16.mxu1 (!%p1195_p3), %v1830_v50 }
 0x1e4   : > { %1354 = vmatpush3.bf16.msra.mxu1 (!%p1195_p3), %v1353_v18 }
 0x1e5   : > { %1355 = vmatprep.subr.bf16.mxu1 (!%p1195_p3), %v1830_v50 }
 0x1e8   : > { %1357 = vmatpush3.bf16.msra.mxu1 (!%p1195_p3), %v1356_v24 }
 0x1e9   : > { %1358 = vmatprep.subr.bf16.mxu1 (!%p1195_p3), %v1830_v50 }
 0x1ec   : > { %1360 = vmatpush3.bf16.msra.mxu1 (!%p1195_p3), %v1359_v30 }
 0x1ed   : > { %1361 = vmatprep.subr.bf16.mxu1 (!%p1195_p3), %v1830_v50 }
 0x1f0   : > { %1363 = vmatpush3.bf16.msra.mxu1 (!%p1195_p3), %v1362_v36 }
 0x2a3   : > { %781 = sbr.rel (%p1195_p3) target bundleno = 908 (0x38c), region = 84 }
 0x2a6   : > { %v772_v44 = vpop.f32.mrb[4].mxu1 }
 0x2a7   : > { %v776_v45 = vadd.f32 %v772_v44, %v700_v43  ;;  %v1242_v46 = vpop.f32.mrb[5].mxu1  ;;  %v966_v43 = vrot.slane (!%p1195_p3), %v961_v42, %v965_v39  ;;  %v957_v44 = vld [vmem:[%s2400_s24] sm:$0x1] (!%p1195_p3) }
 0x2a9   : > { %777 = vst [vmem:[#allocation2] sm:$0x3] %v776_v45  ;;  %v967_v48 = vmul.f32 (!%p1195_p3), %v966_v43, %v957_v44 }
 0x2b0   : > { %v800_v37 = vld [vmem:[#allocation2 + $0x1] sm:$0x1]  ;;  %v783_v38 = vld [vmem:[#allocation2] sm:$0x1] }
 0x2b1   : > { %1276 = vmatmul.mubr.f32.vlgmr.msra.gmra.mrb[0].mxu0 %v800_v37  ;;  %1311 = vmatmul.mubr.f32.vlgmr.msra.gmra.mrb[0].mxu1 %v783_v38 }
 0x384   : > { %v883_v45 = vpop.f32.mrb[0].mxu0  ;;  %v953_v46 = vpop.f32.mrb[0].mxu1 }
 0x385   : > { %v1277_v47 = vpop.f32.mrb[1].mxu0  ;;  %v954_v49 = vadd.f32 %v953_v46, %v883_v45  ;;  %v1312_v50 = vpop.f32.mrb[1].mxu1 }
 0x387   : > { %v968_v52 = vadd.f32 %v967_v48, %v954_v49 }
 0x389   : > { %v980_v53 = vmul.f32 %v1535_v51, %v968_v52 }
 0x38b   : > { %981 = vst [vmem:[%s2232_s7] sm:$0x1] %v980_v53 }
 0x38c PF: > { %s2401_s27 = sld [smem:[#allocation21_spill]]  ;;  %s2402_s20 = sld [smem:[#allocation22_spill]] }
 0x38d   : > { %s2403_s9 = sld [smem:[#allocation33_spill]]  ;;  %s995_s4 = sshll.u32 %s2232_s7, 4  ;;  %s996_s4 = int_to_ptr.vmem [resolvable:$true] %s995_s4 }
 0x38e   : > { %s983_s28 = scalar_lea.sflag [#allocation6], %s485_s23  ;;  %s1680_s6 = scalar_lea.vmem %s996_s4, 16 }
 0x38f   : > { %p1681_p1 = scmp.ne.s32.totalorder %s996_s4, %s1680_s6  ;;  %s1834_s15 = smov [#allocation13]  }
 0x390   : > { %s1684_s26 = sshll.u32 %s1834_s15, 4  ;;  %s1685_s26 = int_to_ptr.vmem [resolvable:$false] %s1684_s26 }
 0x391   : > { %s1686_s21 = scalar_lea.vmem %s1685_s26, 32  ;;  %p1687_p0 = scmp.lt.s32.totalorder %s996_s4, %s1685_s26 }
 0x392   : > { %s1196_s0 = sshll.u32 %s2401_s27, 4  ;;  %p2404_p11 = scmp.ne.s32.totalorder %s2402_s20, 0 }
 0x393   : > { %s2278_s29 = scalar_lea.hbm %s2403_s9, %s1196_s0  ;;  %p1688_p2 = scmp.lt.s32.totalorder %s1686_s21, %s1680_s6 }
 0x394   : > { %p1682_p9 = pnand %p1681_p1, %p2404_p11 }
 0x395   : > { %p1689_p10 = por %p1688_p2, %p1687_p0 }
 0x396   : > { %p1683_p5 = pneg %p1682_p9 }
 0x398   : > { %p1690_p13 = pnand %p1689_p10, %p1683_p5 }
 0x39a   : > { %1693 = shalt.err (!%p1690_p13)
}
 0x39b   : > { %s1694_s23 = scalar_lea.hbm %s2278_s29, 16  ;;  %s1698_s16 = scalar_lea.hbm %s2403_s9, 32 }
 0x39c   : > { %p1695_p6 = scmp.ne.s32.totalorder %s2278_s29, %s1694_s23  ;;  %p1699_p4 = scmp.lt.u32.totalorder %s2278_s29, %s2403_s9 }
 0x39d   : > { %p1700_p7 = scmp.lt.u32.totalorder %s1698_s16, %s1694_s23  ;;  %p1702_p1 = scmp.lt.u32.totalorder %s1694_s23, %s2278_s29 }
 0x39e   : > { %p1696_p8 = pnand %p1695_p6, %p2404_p11 }
 0x39f   : > { %p1701_p3 = por %p1700_p7, %p1699_p4 }
 0x3a0   : > { %p1697_p12 = pneg %p1696_p8 }
 0x3a1   : > { %p1703_p9 = por %p1702_p1, %p1701_p3 }
 0x3a3   : > { %p1704_p5 = pnand %p1703_p9, %p1697_p12 }
 0x3a5   : > { %1707 = shalt.err (!%p1704_p5)
}
 0x3a6   : > { %1384 = dma.vmem_to_hbm [thread:$0]  (%p2404_p11), %s996_s4, 16, %s2278_s29, %s983_s28  }
 0x3a7 PF: > { %s2405_s24 = sld [smem:[#allocation19_spill]]  ;;  %s2406_s27 = sld [smem:[#allocation23_spill]] }
 0x3a8   : > { %p1414_p0 = scmp.ge.s32.totalorder %s1814_s19, 2 }
 0x3ad   : > { %s1007_s0 = sand.u32 1, %s2405_s24   ;;  %p2407_p2 = scmp.ne.s32.totalorder %s2406_s27, 0 }
 0x3ae   : > { %s1008_s30 = scalar_lea.sflag [#allocation6], %s1007_s0 }
 0x3af   : > { %p1404_p10 = pnand %p1414_p0, %p2407_p2 }
 0x3b1   : > { %1769 = dma.done.wait (!%p1404_p10), %s1008_s30, 16  }
 0x3b2   : > { %1771 = vsyncadd (!%p1404_p10), %s1008_s30, 4294967280  ;;  %s29_s19 = sadd.s32 1, %s1814_s19   ;;  %s2408_s20 = sld [smem:[#allocation24_spill]] }
 0x3b3   : > { %p26_p13 = scmp.ge.s32.totalorder %s29_s19, 6   ;;  %s2409_s30 = smov %s1778_s10 }
 0x3b4   : > { %s2410_s10 = smov %s1782_s11  ;;  %s2411_s11 = smov %s2091_s22 }
 0x3b5   : > { %s2412_s12 = smov %s1790_s13  ;;  %s2413_s13 = smov %s1794_s14 }
 0x3b6   : > { %s2414_s14 = smov %s2094_s8  ;;  %s2415_s15 = smov %s1806_s17 }
 0x3b7   : > { %s2416_s16 = smov %s1810_s18  ;;  %s2417_s17 = smov %s2420_s5 }
 0x3b8   : > { %s2418_s18 = smov %s2408_s20  ;;  %28 = sbr.rel (!%p26_p13) target bundleno = 22 (0x16), region = 141 }
 0x3bf   :  { %1012 = vsyncpa [#allocation5], 1 }
 0x3c0   :  { %1014 = vsyncpa [#allocation5 + $0x1], 1 }
 0x3c1   :  { %1015 = vsyncpa [#allocation8], 1 }
 0x3c2   :  { %1017 = vsyncpa [#allocation8 + $0x1], 1 }
 0x3c3   :  { %1018 = vsyncpa [#allocation11], 1 }
 0x3c4   :  { %1019 = vsyncpa [#allocation6], 1 }
 0x3c5   :  { %1021 = vsyncpa [#allocation6 + $0x1], 1 }

</bundles_post_ra>
